<compile_context>
chip_gen: v6e
topology: v6e:2x2x1
jax: 0.10.0
libtpu: 0.0.40
codegen_flags: <defaults>
</compile_context>

<pallas_src>
import numpy as np
import jax
import jax.numpy as jnp
from jax.experimental import pallas as pl
from jax.experimental.pallas import tpu as pltpu


# --------------------------- fused per-block kernel ---------------------------
def _make_kernel(BB, NS, NT, L, D):
    NSNT = NS * NT

    def kernel(bert_ref, idx_ref, tmask_ref,
               wp_ref, bp_ref, ws_ref, bs_ref,
               wdr_ref, bdr_ref, wor_ref, bor_ref,
               wds_ref, bds_ref, wos_ref, bos_ref,
               rat_ref, stance_ref, para_ref):
        # bert_ref  : (BB, L, D) f32   -- raw BERT output for BB paragraphs
        # idx_ref   : (BB, NS, NT) i32 -- token gather indices into the L axis
        # tmask_ref : (BB, NS, NT) f32 -- token mask (lane dim = NT)
        # weights   : bf16, biases f32 (Linear weights stored (in, out))
        # outputs   : rationale logits (BB, NS, 2), stance logits (BB, 1, 3),
        #             paragraph rep (BB, 1, D), all f32.
        f32, bf16 = jnp.float32, jnp.bfloat16

        # ---- fused token gather: one-hot(idx) @ bert rows, on the MXU ----
        bo = bert_ref[...].astype(bf16)                            # (BB, L, D)
        idx = idx_ref[...]                                         # (BB, NS, NT)
        iota_l = jax.lax.broadcasted_iota(jnp.int32, (BB, NS, NT, L), 3)
        onehot = (idx[..., None] == iota_l).astype(bf16)           # (BB, NS, NT, L)
        onehot = onehot.reshape(BB, NSNT, L)
        x = jnp.einsum('bnl,bld->bnd', onehot, bo,
                       preferred_element_type=f32).astype(bf16)    # (BB, NSNT, D)

        # ---- WordAttention: projection + scorer over all BB*NS*NT tokens ----
        x_flat = x.reshape(BB * NSNT, D)
        proj = jnp.tanh(jnp.dot(x_flat, wp_ref[...],
                                preferred_element_type=f32) + bp_ref[...])
        raw = jnp.dot(proj.astype(bf16), ws_ref[...],
                      preferred_element_type=f32) + bs_ref[...]    # (BB*NSNT, 1)
        raw = raw.reshape(BB * NS, NT)                             # lane-dense scores

        tm = tmask_ref[...].reshape(BB * NS, NT)                   # (BB*NS, NT) f32
        valid = tm > 0.0
        masked = jnp.where(valid, raw, jnp.float32(-1e30))
        mx = jnp.max(masked, axis=-1, keepdims=True)               # (BB*NS, 1)
        ex = jnp.where(valid, jnp.exp(masked - mx), jnp.float32(0.0))
        den = jnp.sum(ex, axis=-1, keepdims=True)
        # fully-masked sentence => all-zero attention (matches torch's NaN -> 0)
        att = ex * pl.reciprocal(
            jnp.where(den == 0.0, jnp.float32(1.0), den), approx=True)  # (BB*NS, NT)

        x_sent = x.reshape(BB * NS, NT, D)                         # bf16
        reps = jnp.einsum('bqt,btd->bqd', att.astype(bf16)[:, None, :], x_sent,
                          preferred_element_type=f32).reshape(BB * NS, D)

        # ---- rationale ClassificationHead: dense -> tanh -> out_proj ----
        hr = jnp.tanh(jnp.dot(reps.astype(bf16), wdr_ref[...],
                              preferred_element_type=f32) + bdr_ref[...])
        rat = jnp.dot(hr.astype(bf16), wor_ref[...],
                      preferred_element_type=f32) + bor_ref[...]   # (BB*NS, 2)
        rat_ref[...] = rat.reshape(BB, NS, 2)

        # ---- DynamicSentenceAttention (sample_p == 1 path: valid = l1 > l0) ----
        l0 = rat[:, 0:1]
        l1 = rat[:, 1:2]
        sent_valid = tm[:, 0:1] > 0.0                              # (BB*NS, 1)
        keep = jnp.logical_and(sent_valid, l1 > l0)
        s_score = jnp.where(keep, l1, jnp.float32(-10000.0)).reshape(BB, NS, 1)
        s_mx = jnp.max(s_score, axis=1, keepdims=True)             # (BB, 1, 1)
        s_ex = jnp.exp(s_score - s_mx)
        s_den = jnp.sum(s_ex, axis=1, keepdims=True)
        satt = s_ex * pl.reciprocal(s_den, approx=True)            # (BB, NS, 1)
        para = jnp.sum(satt * reps.reshape(BB, NS, D), axis=1)     # (BB, D) f32

        # ---- stance ClassificationHead on the paragraph representation ----
        hs = jnp.tanh(jnp.dot(para.astype(bf16), wds_ref[...],
                              preferred_element_type=f32) + bds_ref[...])
        st = jnp.dot(hs.astype(bf16), wos_ref[...],
                     preferred_element_type=f32) + bos_ref[...]    # (BB, 3)
        stance_ref[...] = st.reshape(BB, 1, 3)
        para_ref[...] = para.reshape(BB, 1, D)

    return kernel


def joint_paragraph_pallas(bert_out, indices_by_batch, token_mask, params, *, bb=None):
    B, L, D = bert_out.shape
    _, NS, NT = indices_by_batch.shape
    f32, bf16 = jnp.float32, jnp.bfloat16

    if bb is None:
        # Batch several paragraphs per grid step but keep grid >= 2 when B >= 2
        # so both v7x TensorCores stay busy.
        bb = max(1, min(8, pl.cdiv(B, 2)))
    B_pad = pl.cdiv(B, bb) * bb
    if B_pad != B:
        pad = B_pad - B
        bert_out = jnp.pad(bert_out, ((0, pad), (0, 0), (0, 0)))
        indices_by_batch = jnp.pad(indices_by_batch, ((0, pad), (0, 0), (0, 0)))
        token_mask = jnp.pad(token_mask, ((0, pad), (0, 0), (0, 0)))
    grid = (B_pad // bb,)

    args = (
        bert_out.astype(f32),
        indices_by_batch.astype(jnp.int32),
        token_mask.astype(f32),
        params["w_attn_proj"].astype(bf16), params["b_attn_proj"].astype(f32),
        params["w_attn_score"].astype(bf16), params["b_attn_score"].astype(f32),
        params["w_rat_dense"].astype(bf16), params["b_rat_dense"].astype(f32),
        params["w_rat_out"].astype(bf16), params["b_rat_out"].astype(f32),
        params["w_stance_dense"].astype(bf16), params["b_stance_dense"].astype(f32),
        params["w_stance_out"].astype(bf16), params["b_stance_out"].astype(f32),
    )

    def rep(shape):
        # Replicated (constant index_map) weight / bias block.
        # TODO(synk): at BERT dims, single-buffer these (pipeline_mode=pl.Buffered(1))
        # to reclaim VMEM; at D=128 double buffering costs < 0.2 MiB so it is skipped.
        return pl.BlockSpec(shape, lambda b: (0,) * len(shape))

    in_specs = [
        pl.BlockSpec((bb, L, D), lambda b: (b, 0, 0)),
        pl.BlockSpec((bb, NS, NT), lambda b: (b, 0, 0)),
        pl.BlockSpec((bb, NS, NT), lambda b: (b, 0, 0)),
        rep((D, D)), rep((1, D)), rep((D, 1)), rep((1, 1)),
        rep((D, D)), rep((1, D)), rep((D, 2)), rep((1, 2)),
        rep((D, D)), rep((1, D)), rep((D, 3)), rep((1, 3)),
    ]
    out_shape = (
        jax.ShapeDtypeStruct((B_pad, NS, 2), f32),   # rationale logits
        jax.ShapeDtypeStruct((B_pad, 1, 3), f32),    # stance logits
        jax.ShapeDtypeStruct((B_pad, 1, D), f32),    # paragraph rep
    )
    out_specs = (
        pl.BlockSpec((bb, NS, 2), lambda b: (b, 0, 0)),
        pl.BlockSpec((bb, 1, 3), lambda b: (b, 0, 0)),
        pl.BlockSpec((bb, 1, D), lambda b: (b, 0, 0)),
    )
    rat, stance, para = pl.pallas_call(
        _make_kernel(bb, NS, NT, L, D),
        out_shape=out_shape,
        grid=grid,
        in_specs=in_specs,
        out_specs=out_specs,
        compiler_params=pltpu.CompilerParams(
            dimension_semantics=("parallel",),
            vmem_limit_bytes=32 * 1024 * 1024),
    )(*args)
    return rat[:B], stance[:B, 0, :], para[:B, 0, :]


# ------------------------------------ glue -------------------------------------
def cross_entropy(logits, labels):
    logp = jax.nn.log_softmax(logits.astype(jnp.float32), axis=-1)
    nll = -jnp.take_along_axis(logp, labels[:, None], axis=-1)[:, 0]
    return jnp.mean(nll)


def cross_entropy_ignore(logits, labels, ignore_index=2):
    valid = labels != ignore_index
    logp = jax.nn.log_softmax(logits.astype(jnp.float32), axis=-1)
    safe = jnp.where(valid, labels, 0)
    nll = -jnp.take_along_axis(logp, safe[:, None], axis=-1)[:, 0]
    nll = jnp.where(valid, nll, 0.0)
    denom = jnp.maximum(jnp.sum(valid.astype(jnp.float32)), 1.0)
    return jnp.sum(nll) / denom


def init_params(key, D):
    # Deterministic synthetic init; Linear weights stored as (in_features, out_features).
    # DynamicSentenceAttention.att_proj / att_scorer params are never used by the
    # torch module's forward, so they are omitted.
    ks = jax.random.split(key, 12)
    s = 0.05
    n = lambda k, shape: s * jax.random.normal(k, shape, jnp.float32)
    return dict(
        w_attn_proj=n(ks[0], (D, D)),    b_attn_proj=n(ks[1], (1, D)),
        w_attn_score=n(ks[2], (D, 1)),   b_attn_score=n(ks[3], (1, 1)),
        w_rat_dense=n(ks[4], (D, D)),    b_rat_dense=n(ks[5], (1, D)),
        w_rat_out=n(ks[6], (D, 2)),      b_rat_out=n(ks[7], (1, 2)),
        w_stance_dense=n(ks[8], (D, D)), b_stance_dense=n(ks[9], (1, D)),
        w_stance_out=n(ks[10], (D, 3)),  b_stance_out=n(ks[11], (1, 3)),
    )


def joint_paragraph_classifier_forward(params, bert_out, batch_indices, indices_by_batch,
                                       mask, stance_label=None, rationale_label=None,
                                       rationale_score=False, stance_score=False):
    # TODO(synk): the BERT encoder itself (self.bert(**encoded_dict)) has no clean
    # single-kernel Pallas equivalent here; `bert_out` stands in for its output.
    # The token gather bert_out[batch_indices, indices_by_batch, :] is fused into the
    # kernel; it assumes batch_indices[b, ...] == b (how the original pipeline builds it).
    del batch_indices

    rationale_logits, stance_out, paragraph_rep = joint_paragraph_pallas(
        bert_out, indices_by_batch, mask, params)
    sentence_mask = mask[:, :, 0]                                     # (B, NS)

    # TODO(synk): the sample_p < 1 training-time branch (valid_scores taken from the
    # rationale labels instead of predicted logits) is not wired into the fused
    # kernel; the default / inference sample_p = 1 path is implemented.
    stance_loss = cross_entropy(stance_out, stance_label) if stance_label is not None else None
    if rationale_label is not None:
        rationale_loss = cross_entropy_ignore(
            rationale_logits.reshape(-1, 2), rationale_label.reshape(-1), ignore_index=2)
    else:
        rationale_loss = None

    stance_preds = np.asarray(jnp.argmax(stance_out, axis=-1)).tolist()
    if rationale_score:
        rationale_pred = rationale_logits[:, :, 1]
    else:
        rationale_pred = jnp.argmax(rationale_logits, axis=-1)
    pred_np = np.asarray(rationale_pred)
    smask_np = np.asarray(sentence_mask).astype(bool)
    rationale_out = [p[m].tolist() for p, m in zip(pred_np, smask_np)]

    # `extras` is not part of the torch return signature; returned for inspection.
    extras = dict(rationale_logits=rationale_logits, stance_out=stance_out,
                  paragraph_rep=paragraph_rep)
    if stance_score:
        return (rationale_out, stance_preds, rationale_loss, stance_loss,
                np.asarray(stance_out).tolist(), extras)
    return rationale_out, stance_preds, rationale_loss, stance_loss, extras


if __name__ == "__main__":
    key = jax.random.PRNGKey(0)
    # batch, sentences/paragraph, tokens/sentence (multiple of 16), bert_dim, seq len
    B, NS, NT, D, L = 4, 8, 16, 128, 32

    k_param, k_bert, k_idx, k_len, k_rlab, k_slab = jax.random.split(key, 6)
    params = init_params(k_param, D)

    bert_out = jax.random.normal(k_bert, (B, L, D), jnp.float32)
    indices_by_batch = jax.random.randint(k_idx, (B, NS, NT), 0, L)
    batch_indices = jnp.broadcast_to(jnp.arange(B)[:, None, None], (B, NS, NT))

    lengths = jax.random.randint(k_len, (B, NS), 1, NT + 1)
    lengths = lengths.at[0, NS - 1].set(0)   # one fully-masked sentence (NaN->0 path)
    mask = (jnp.arange(NT)[None, None, :] < lengths[:, :, None]).astype(jnp.float32)

    rationale_label = jax.random.randint(k_rlab, (B, NS), 0, 3)   # includes ignore_index=2
    stance_label = jax.random.randint(k_slab, (B,), 0, 3)

    (rationale_out, stance_preds, rationale_loss, stance_loss,
     extras) = joint_paragraph_classifier_forward(
        params, bert_out, batch_indices, indices_by_batch, mask,
        stance_label=stance_label, rationale_label=rationale_label)

    jax.block_until_ready((rationale_loss, stance_loss,
                           extras["rationale_logits"], extras["stance_out"],
                           extras["paragraph_rep"]))
    assert extras["rationale_logits"].shape == (B, NS, 2)
    assert extras["stance_out"].shape == (B, 3)
    assert extras["paragraph_rep"].shape == (B, D)
    assert bool(jnp.all(jnp.isfinite(extras["rationale_logits"])))
    assert bool(jnp.all(jnp.isfinite(extras["stance_out"])))
    assert bool(jnp.all(jnp.isfinite(extras["paragraph_rep"])))
    assert len(rationale_out) == B and len(stance_preds) == B
    print("KERNEL_OK")
</pallas_src>

<mosaic_0001>
module attributes {stable_mosaic.version = 11 : i64} {
  func.func @kernel(%arg0: i32, %arg1: memref<2x32x128xf32, #tpu.memory_space<vmem>>, %arg2: memref<2x8x16xi32, #tpu.memory_space<vmem>>, %arg3: memref<2x8x16xf32, #tpu.memory_space<vmem>>, %arg4: memref<128x128xbf16, #tpu.memory_space<vmem>>, %arg5: memref<1x128xf32, #tpu.memory_space<vmem>>, %arg6: memref<128x1xbf16, #tpu.memory_space<vmem>>, %arg7: memref<1x1xf32, #tpu.memory_space<vmem>>, %arg8: memref<128x128xbf16, #tpu.memory_space<vmem>>, %arg9: memref<1x128xf32, #tpu.memory_space<vmem>>, %arg10: memref<128x2xbf16, #tpu.memory_space<vmem>>, %arg11: memref<1x2xf32, #tpu.memory_space<vmem>>, %arg12: memref<128x128xbf16, #tpu.memory_space<vmem>>, %arg13: memref<1x128xf32, #tpu.memory_space<vmem>>, %arg14: memref<128x3xbf16, #tpu.memory_space<vmem>>, %arg15: memref<1x3xf32, #tpu.memory_space<vmem>>, %arg16: memref<2x8x2xf32, #tpu.memory_space<vmem>>, %arg17: memref<2x1x3xf32, #tpu.memory_space<vmem>>, %arg18: memref<2x1x128xf32, #tpu.memory_space<vmem>>) attributes {dimension_semantics = [#tpu.dimension_semantics<parallel>], iteration_bounds = array<i64: 2>, scalar_prefetch = 0 : i64, scratch_operands = 0 : i64, tpu.core_type = #tpu.core_type<tc>, window_params = [{transform_indices = @transform_0, window_bounds = array<i64: 2, 32, 128>}, {transform_indices = @transform_1, window_bounds = array<i64: 2, 8, 16>}, {transform_indices = @transform_2, window_bounds = array<i64: 2, 8, 16>}, {pipeline_mode = #tpu.pipeline_mode<synchronous>, transform_indices = @transform_3, window_bounds = array<i64: 128, 128>}, {pipeline_mode = #tpu.pipeline_mode<synchronous>, transform_indices = @transform_4, window_bounds = array<i64: 1, 128>}, {pipeline_mode = #tpu.pipeline_mode<synchronous>, transform_indices = @transform_5, window_bounds = array<i64: 128, 1>}, {pipeline_mode = #tpu.pipeline_mode<synchronous>, transform_indices = @transform_6, window_bounds = array<i64: 1, 1>}, {pipeline_mode = #tpu.pipeline_mode<synchronous>, transform_indices = @transform_7, window_bounds = array<i64: 128, 128>}, {pipeline_mode = #tpu.pipeline_mode<synchronous>, transform_indices = @transform_8, window_bounds = array<i64: 1, 128>}, {pipeline_mode = #tpu.pipeline_mode<synchronous>, transform_indices = @transform_9, window_bounds = array<i64: 128, 2>}, {pipeline_mode = #tpu.pipeline_mode<synchronous>, transform_indices = @transform_10, window_bounds = array<i64: 1, 2>}, {pipeline_mode = #tpu.pipeline_mode<synchronous>, transform_indices = @transform_11, window_bounds = array<i64: 128, 128>}, {pipeline_mode = #tpu.pipeline_mode<synchronous>, transform_indices = @transform_12, window_bounds = array<i64: 1, 128>}, {pipeline_mode = #tpu.pipeline_mode<synchronous>, transform_indices = @transform_13, window_bounds = array<i64: 128, 3>}, {pipeline_mode = #tpu.pipeline_mode<synchronous>, transform_indices = @transform_14, window_bounds = array<i64: 1, 3>}, {transform_indices = @transform_15, window_bounds = array<i64: 2, 8, 2>}, {transform_indices = @transform_16, window_bounds = array<i64: 2, 1, 3>}, {transform_indices = @transform_17, window_bounds = array<i64: 2, 1, 128>}]} {
    %c0 = arith.constant 0 : index
    %c0_0 = arith.constant 0 : index
    %c0_1 = arith.constant 0 : index
    %0 = vector.load %arg1[%c0, %c0_0, %c0_1] : memref<2x32x128xf32, #tpu.memory_space<vmem>>, vector<2x32x128xf32>
    %1 = arith.truncf %0 : vector<2x32x128xf32> to vector<2x32x128xbf16>
    %c0_2 = arith.constant 0 : index
    %c0_3 = arith.constant 0 : index
    %c0_4 = arith.constant 0 : index
    %2 = vector.load %arg2[%c0_2, %c0_3, %c0_4] : memref<2x8x16xi32, #tpu.memory_space<vmem>>, vector<2x8x16xi32>
    %3 = tpu.iota {dimensions = array<i32: 3>} : vector<2x8x16x32xi32>
    %4 = vector.shape_cast %2 : vector<2x8x16xi32> to vector<2x8x16x1xi32>
    %5 = vector.broadcast %4 : vector<2x8x16x1xi32> to vector<2x8x16x32xi32>
    %6 = arith.cmpi eq, %5, %3 : vector<2x8x16x32xi32>
    %7 = arith.extui %6 : vector<2x8x16x32xi1> to vector<2x8x16x32xi32>
    %8 = arith.sitofp %7 : vector<2x8x16x32xi32> to vector<2x8x16x32xf32>
    %9 = arith.truncf %8 : vector<2x8x16x32xf32> to vector<2x8x16x32xbf16>
    %10 = vector.shape_cast %9 : vector<2x8x16x32xbf16> to vector<2x128x32xbf16>
    "tpu.trace_start"() <{level = 10 : i32, message = "bnl,bld->bnd"}> : () -> ()
    %cst = arith.constant dense<0.000000e+00> : vector<2x128x128xf32>
    %11 = tpu.matmul %10, %1, %cst {dimension_numbers = #tpu.dot_dimension_numbers<[2], [1], [1], [2], [0, 0, 0, 1, 1, 2], [0], [0]>} : vector<2x128x32xbf16>, vector<2x32x128xbf16>, vector<2x128x128xf32> -> vector<2x128x128xf32>
    "tpu.trace_stop"() : () -> ()
    %12 = arith.truncf %11 : vector<2x128x128xf32> to vector<2x128x128xbf16>
    %13 = vector.shape_cast %12 : vector<2x128x128xbf16> to vector<256x128xbf16>
    %c0_5 = arith.constant 0 : index
    %c0_6 = arith.constant 0 : index
    %14 = vector.load %arg4[%c0_5, %c0_6] : memref<128x128xbf16, #tpu.memory_space<vmem>>, vector<128x128xbf16>
    %cst_7 = arith.constant dense<0.000000e+00> : vector<256x128xf32>
    %15 = tpu.matmul %13, %14, %cst_7 {dimension_numbers = #tpu.dot_dimension_numbers<[1], [0], [0], [1], [0, 0, 1, 1], [], []>} : vector<256x128xbf16>, vector<128x128xbf16>, vector<256x128xf32> -> vector<256x128xf32>
    %c0_8 = arith.constant 0 : index
    %c0_9 = arith.constant 0 : index
    %16 = vector.load %arg5[%c0_8, %c0_9] : memref<1x128xf32, #tpu.memory_space<vmem>>, vector<1x128xf32>
    %17 = vector.broadcast %16 : vector<1x128xf32> to vector<256x128xf32>
    %18 = arith.addf %15, %17 : vector<256x128xf32>
    %19 = math.tanh %18 : vector<256x128xf32>
    %20 = arith.truncf %19 : vector<256x128xf32> to vector<256x128xbf16>
    %c0_10 = arith.constant 0 : index
    %c0_11 = arith.constant 0 : index
    %21 = vector.load %arg6[%c0_10, %c0_11] : memref<128x1xbf16, #tpu.memory_space<vmem>>, vector<128x1xbf16>
    %cst_12 = arith.constant dense<0.000000e+00> : vector<256x1xf32>
    %22 = tpu.matmul %20, %21, %cst_12 {dimension_numbers = #tpu.dot_dimension_numbers<[1], [0], [0], [1], [0, 0, 1, 1], [], []>} : vector<256x128xbf16>, vector<128x1xbf16>, vector<256x1xf32> -> vector<256x1xf32>
    %c0_13 = arith.constant 0 : index
    %c0_14 = arith.constant 0 : index
    %23 = vector.load %arg7[%c0_13, %c0_14] : memref<1x1xf32, #tpu.memory_space<vmem>>, vector<1x1xf32>
    %24 = vector.broadcast %23 : vector<1x1xf32> to vector<256x1xf32>
    %25 = arith.addf %22, %24 : vector<256x1xf32>
    %26 = vector.shape_cast %25 : vector<256x1xf32> to vector<16x16xf32>
    %c0_15 = arith.constant 0 : index
    %c0_16 = arith.constant 0 : index
    %c0_17 = arith.constant 0 : index
    %27 = vector.load %arg3[%c0_15, %c0_16, %c0_17] : memref<2x8x16xf32, #tpu.memory_space<vmem>>, vector<2x8x16xf32>
    %28 = vector.shape_cast %27 : vector<2x8x16xf32> to vector<16x16xf32>
    %cst_18 = arith.constant 0.000000e+00 : f32
    %29 = vector.broadcast %cst_18 : f32 to vector<16x16xf32>
    %30 = arith.cmpf ogt, %28, %29 : vector<16x16xf32>
    %cst_19 = arith.constant -1.000000e+30 : f32
    %31 = vector.broadcast %cst_19 : f32 to vector<16x16xf32>
    %32 = arith.select %30, %26, %31 : vector<16x16xi1>, vector<16x16xf32>
    %cst_20 = arith.constant dense<0xFF800000> : vector<16xf32>
    %33 = vector.multi_reduction <maximumf>, %32, %cst_20 [1] : vector<16x16xf32> to vector<16xf32>
    %34 = vector.shape_cast %33 : vector<16xf32> to vector<16x1xf32>
    %35 = vector.broadcast %34 : vector<16x1xf32> to vector<16x16xf32>
    %36 = arith.subf %32, %35 : vector<16x16xf32>
    %37 = math.exp %36 : vector<16x16xf32>
    %cst_21 = arith.constant 0.000000e+00 : f32
    %38 = vector.broadcast %cst_21 : f32 to vector<16x16xf32>
    %39 = arith.select %30, %37, %38 : vector<16x16xi1>, vector<16x16xf32>
    %cst_22 = arith.constant dense<0.000000e+00> : vector<16xf32>
    %40 = vector.multi_reduction <add>, %39, %cst_22 [1] : vector<16x16xf32> to vector<16xf32>
    %41 = vector.shape_cast %40 : vector<16xf32> to vector<16x1xf32>
    %cst_23 = arith.constant 0.000000e+00 : f32
    %42 = vector.broadcast %cst_23 : f32 to vector<16x1xf32>
    %43 = arith.cmpf oeq, %41, %42 : vector<16x1xf32>
    %cst_24 = arith.constant 1.000000e+00 : f32
    %44 = vector.broadcast %cst_24 : f32 to vector<16x1xf32>
    %45 = arith.select %43, %44, %41 : vector<16x1xi1>, vector<16x1xf32>
    %46 = tpu.reciprocal %45 {approx = true} : vector<16x1xf32> -> vector<16x1xf32>
    %47 = vector.broadcast %46 : vector<16x1xf32> to vector<16x16xf32>
    %48 = arith.mulf %39, %47 : vector<16x16xf32>
    %49 = vector.shape_cast %12 : vector<2x128x128xbf16> to vector<16x16x128xbf16>
    %50 = arith.truncf %48 : vector<16x16xf32> to vector<16x16xbf16>
    %51 = vector.shape_cast %50 : vector<16x16xbf16> to vector<16x1x16xbf16>
    "tpu.trace_start"() <{level = 10 : i32, message = "bqt,btd->bqd"}> : () -> ()
    %cst_25 = arith.constant dense<0.000000e+00> : vector<16x1x128xf32>
    %52 = tpu.matmul %51, %49, %cst_25 {dimension_numbers = #tpu.dot_dimension_numbers<[2], [1], [1], [2], [0, 0, 0, 1, 1, 2], [0], [0]>} : vector<16x1x16xbf16>, vector<16x16x128xbf16>, vector<16x1x128xf32> -> vector<16x1x128xf32>
    "tpu.trace_stop"() : () -> ()
    %53 = vector.shape_cast %52 : vector<16x1x128xf32> to vector<16x128xf32>
    %54 = arith.truncf %53 : vector<16x128xf32> to vector<16x128xbf16>
    %c0_26 = arith.constant 0 : index
    %c0_27 = arith.constant 0 : index
    %55 = vector.load %arg8[%c0_26, %c0_27] : memref<128x128xbf16, #tpu.memory_space<vmem>>, vector<128x128xbf16>
    %cst_28 = arith.constant dense<0.000000e+00> : vector<16x128xf32>
    %56 = tpu.matmul %54, %55, %cst_28 {dimension_numbers = #tpu.dot_dimension_numbers<[1], [0], [0], [1], [0, 0, 1, 1], [], []>} : vector<16x128xbf16>, vector<128x128xbf16>, vector<16x128xf32> -> vector<16x128xf32>
    %c0_29 = arith.constant 0 : index
    %c0_30 = arith.constant 0 : index
    %57 = vector.load %arg9[%c0_29, %c0_30] : memref<1x128xf32, #tpu.memory_space<vmem>>, vector<1x128xf32>
    %58 = vector.broadcast %57 : vector<1x128xf32> to vector<16x128xf32>
    %59 = arith.addf %56, %58 : vector<16x128xf32>
    %60 = math.tanh %59 : vector<16x128xf32>
    %61 = arith.truncf %60 : vector<16x128xf32> to vector<16x128xbf16>
    %c0_31 = arith.constant 0 : index
    %c0_32 = arith.constant 0 : index
    %62 = vector.load %arg10[%c0_31, %c0_32] : memref<128x2xbf16, #tpu.memory_space<vmem>>, vector<128x2xbf16>
    %cst_33 = arith.constant dense<0.000000e+00> : vector<16x2xf32>
    %63 = tpu.matmul %61, %62, %cst_33 {dimension_numbers = #tpu.dot_dimension_numbers<[1], [0], [0], [1], [0, 0, 1, 1], [], []>} : vector<16x128xbf16>, vector<128x2xbf16>, vector<16x2xf32> -> vector<16x2xf32>
    %c0_34 = arith.constant 0 : index
    %c0_35 = arith.constant 0 : index
    %64 = vector.load %arg11[%c0_34, %c0_35] : memref<1x2xf32, #tpu.memory_space<vmem>>, vector<1x2xf32>
    %65 = vector.broadcast %64 : vector<1x2xf32> to vector<16x2xf32>
    %66 = arith.addf %63, %65 : vector<16x2xf32>
    %67 = vector.shape_cast %66 : vector<16x2xf32> to vector<2x8x2xf32>
    %c0_36 = arith.constant 0 : index
    %c0_37 = arith.constant 0 : index
    %c0_38 = arith.constant 0 : index
    %68 = vector.load %arg16[%c0_36, %c0_37, %c0_38] : memref<2x8x2xf32, #tpu.memory_space<vmem>>, vector<2x8x2xf32>
    tpu.vector_store %arg16[%c0_36, %c0_37, %c0_38], %67 {strides = array<i32>} : memref<2x8x2xf32, #tpu.memory_space<vmem>>, vector<2x8x2xf32>,
    %69 = vector.extract_strided_slice %66 {offsets = [0, 0], sizes = [16, 1], strides = [1, 1]} : vector<16x2xf32> to vector<16x1xf32>
    %70 = vector.extract_strided_slice %66 {offsets = [0, 1], sizes = [16, 1], strides = [1, 1]} : vector<16x2xf32> to vector<16x1xf32>
    %71 = vector.extract_strided_slice %28 {offsets = [0, 0], sizes = [16, 1], strides = [1, 1]} : vector<16x16xf32> to vector<16x1xf32>
    %cst_39 = arith.constant 0.000000e+00 : f32
    %72 = vector.broadcast %cst_39 : f32 to vector<16x1xf32>
    %73 = arith.cmpf ogt, %71, %72 : vector<16x1xf32>
    %74 = arith.cmpf ogt, %70, %69 : vector<16x1xf32>
    %75 = arith.andi %73, %74 : vector<16x1xi1>
    %cst_40 = arith.constant -1.000000e+04 : f32
    %76 = vector.broadcast %cst_40 : f32 to vector<16x1xf32>
    %77 = arith.select %75, %70, %76 : vector<16x1xi1>, vector<16x1xf32>
    %78 = vector.shape_cast %77 : vector<16x1xf32> to vector<2x8x1xf32>
    %cst_41 = arith.constant dense<0xFF800000> : vector<2x1xf32>
    %79 = vector.multi_reduction <maximumf>, %78, %cst_41 [1] : vector<2x8x1xf32> to vector<2x1xf32>
    %80 = vector.shape_cast %79 : vector<2x1xf32> to vector<2x1x1xf32>
    %81 = vector.broadcast %80 : vector<2x1x1xf32> to vector<2x8x1xf32>
    %82 = arith.subf %78, %81 : vector<2x8x1xf32>
    %83 = math.exp %82 : vector<2x8x1xf32>
    %cst_42 = arith.constant dense<0.000000e+00> : vector<2x1xf32>
    %84 = vector.multi_reduction <add>, %83, %cst_42 [1] : vector<2x8x1xf32> to vector<2x1xf32>
    %85 = vector.shape_cast %84 : vector<2x1xf32> to vector<2x1x1xf32>
    %86 = tpu.reciprocal %85 {approx = true} : vector<2x1x1xf32> -> vector<2x1x1xf32>
    %87 = vector.broadcast %86 : vector<2x1x1xf32> to vector<2x8x1xf32>
    %88 = arith.mulf %83, %87 : vector<2x8x1xf32>
    %89 = vector.shape_cast %53 : vector<16x128xf32> to vector<2x8x128xf32>
    %90 = vector.broadcast %88 : vector<2x8x1xf32> to vector<2x8x128xf32>
    %91 = arith.mulf %90, %89 : vector<2x8x128xf32>
    %cst_43 = arith.constant dense<0.000000e+00> : vector<2x128xf32>
    %92 = vector.multi_reduction <add>, %91, %cst_43 [1] : vector<2x8x128xf32> to vector<2x128xf32>
    %93 = arith.truncf %92 : vector<2x128xf32> to vector<2x128xbf16>
    %c0_44 = arith.constant 0 : index
    %c0_45 = arith.constant 0 : index
    %94 = vector.load %arg12[%c0_44, %c0_45] : memref<128x128xbf16, #tpu.memory_space<vmem>>, vector<128x128xbf16>
    %cst_46 = arith.constant dense<0.000000e+00> : vector<2x128xf32>
    %95 = tpu.matmul %93, %94, %cst_46 {dimension_numbers = #tpu.dot_dimension_numbers<[1], [0], [0], [1], [0, 0, 1, 1], [], []>} : vector<2x128xbf16>, vector<128x128xbf16>, vector<2x128xf32> -> vector<2x128xf32>
    %c0_47 = arith.constant 0 : index
    %c0_48 = arith.constant 0 : index
    %96 = vector.load %arg13[%c0_47, %c0_48] : memref<1x128xf32, #tpu.memory_space<vmem>>, vector<1x128xf32>
    %97 = vector.broadcast %96 : vector<1x128xf32> to vector<2x128xf32>
    %98 = arith.addf %95, %97 : vector<2x128xf32>
    %99 = math.tanh %98 : vector<2x128xf32>
    %100 = arith.truncf %99 : vector<2x128xf32> to vector<2x128xbf16>
    %c0_49 = arith.constant 0 : index
    %c0_50 = arith.constant 0 : index
    %101 = vector.load %arg14[%c0_49, %c0_50] : memref<128x3xbf16, #tpu.memory_space<vmem>>, vector<128x3xbf16>
    %cst_51 = arith.constant dense<0.000000e+00> : vector<2x3xf32>
    %102 = tpu.matmul %100, %101, %cst_51 {dimension_numbers = #tpu.dot_dimension_numbers<[1], [0], [0], [1], [0, 0, 1, 1], [], []>} : vector<2x128xbf16>, vector<128x3xbf16>, vector<2x3xf32> -> vector<2x3xf32>
    %c0_52 = arith.constant 0 : index
    %c0_53 = arith.constant 0 : index
    %103 = vector.load %arg15[%c0_52, %c0_53] : memref<1x3xf32, #tpu.memory_space<vmem>>, vector<1x3xf32>
    %104 = vector.broadcast %103 : vector<1x3xf32> to vector<2x3xf32>
    %105 = arith.addf %102, %104 : vector<2x3xf32>
    %106 = vector.shape_cast %105 : vector<2x3xf32> to vector<2x1x3xf32>
    %c0_54 = arith.constant 0 : index
    %c0_55 = arith.constant 0 : index
    %c0_56 = arith.constant 0 : index
    %107 = vector.load %arg17[%c0_54, %c0_55, %c0_56] : memref<2x1x3xf32, #tpu.memory_space<vmem>>, vector<2x1x3xf32>
    tpu.vector_store %arg17[%c0_54, %c0_55, %c0_56], %106 {strides = array<i32>} : memref<2x1x3xf32, #tpu.memory_space<vmem>>, vector<2x1x3xf32>,
    %108 = vector.shape_cast %92 : vector<2x128xf32> to vector<2x1x128xf32>
    %c0_57 = arith.constant 0 : index
    %c0_58 = arith.constant 0 : index
    %c0_59 = arith.constant 0 : index
    %109 = vector.load %arg18[%c0_57, %c0_58, %c0_59] : memref<2x1x128xf32, #tpu.memory_space<vmem>>, vector<2x1x128xf32>
    tpu.vector_store %arg18[%c0_57, %c0_58, %c0_59], %108 {strides = array<i32>} : memref<2x1x128xf32, #tpu.memory_space<vmem>>, vector<2x1x128xf32>,
    return
  }
  func.func @transform_0(%arg0: i32) -> (i32, i32, i32) {
    %c0_i32 = arith.constant 0 : i32
    %c0_i32_0 = arith.constant 0 : i32
    %c0_i32_1 = arith.constant 0 : i32
    return %arg0, %c0_i32, %c0_i32_0 : i32, i32, i32
  }
  func.func @transform_1(%arg0: i32) -> (i32, i32, i32) {
    %c0_i32 = arith.constant 0 : i32
    %c0_i32_0 = arith.constant 0 : i32
    %c0_i32_1 = arith.constant 0 : i32
    return %arg0, %c0_i32, %c0_i32_0 : i32, i32, i32
  }
  func.func @transform_2(%arg0: i32) -> (i32, i32, i32) {
    %c0_i32 = arith.constant 0 : i32
    %c0_i32_0 = arith.constant 0 : i32
    %c0_i32_1 = arith.constant 0 : i32
    return %arg0, %c0_i32, %c0_i32_0 : i32, i32, i32
  }
  func.func @transform_3(%arg0: i32) -> (i32, i32) {
    %c0_i32 = arith.constant 0 : i32
    %c0_i32_0 = arith.constant 0 : i32
    %c0_i32_1 = arith.constant 0 : i32
    return %c0_i32, %c0_i32_0 : i32, i32
  }
  func.func @transform_4(%arg0: i32) -> (i32, i32) {
    %c0_i32 = arith.constant 0 : i32
    %c0_i32_0 = arith.constant 0 : i32
    %c0_i32_1 = arith.constant 0 : i32
    return %c0_i32, %c0_i32_0 : i32, i32
  }
  func.func @transform_5(%arg0: i32) -> (i32, i32) {
    %c0_i32 = arith.constant 0 : i32
    %c0_i32_0 = arith.constant 0 : i32
    %c0_i32_1 = arith.constant 0 : i32
    return %c0_i32, %c0_i32_0 : i32, i32
  }
  func.func @transform_6(%arg0: i32) -> (i32, i32) {
    %c0_i32 = arith.constant 0 : i32
    %c0_i32_0 = arith.constant 0 : i32
    %c0_i32_1 = arith.constant 0 : i32
    return %c0_i32, %c0_i32_0 : i32, i32
  }
  func.func @transform_7(%arg0: i32) -> (i32, i32) {
    %c0_i32 = arith.constant 0 : i32
    %c0_i32_0 = arith.constant 0 : i32
    %c0_i32_1 = arith.constant 0 : i32
    return %c0_i32, %c0_i32_0 : i32, i32
  }
  func.func @transform_8(%arg0: i32) -> (i32, i32) {
    %c0_i32 = arith.constant 0 : i32
    %c0_i32_0 = arith.constant 0 : i32
    %c0_i32_1 = arith.constant 0 : i32
    return %c0_i32, %c0_i32_0 : i32, i32
  }
  func.func @transform_9(%arg0: i32) -> (i32, i32) {
    %c0_i32 = arith.constant 0 : i32
    %c0_i32_0 = arith.constant 0 : i32
    %c0_i32_1 = arith.constant 0 : i32
    return %c0_i32, %c0_i32_0 : i32, i32
  }
  func.func @transform_10(%arg0: i32) -> (i32, i32) {
    %c0_i32 = arith.constant 0 : i32
    %c0_i32_0 = arith.constant 0 : i32
    %c0_i32_1 = arith.constant 0 : i32
    return %c0_i32, %c0_i32_0 : i32, i32
  }
  func.func @transform_11(%arg0: i32) -> (i32, i32) {
    %c0_i32 = arith.constant 0 : i32
    %c0_i32_0 = arith.constant 0 : i32
    %c0_i32_1 = arith.constant 0 : i32
    return %c0_i32, %c0_i32_0 : i32, i32
  }
  func.func @transform_12(%arg0: i32) -> (i32, i32) {
    %c0_i32 = arith.constant 0 : i32
    %c0_i32_0 = arith.constant 0 : i32
    %c0_i32_1 = arith.constant 0 : i32
    return %c0_i32, %c0_i32_0 : i32, i32
  }
  func.func @transform_13(%arg0: i32) -> (i32, i32) {
    %c0_i32 = arith.constant 0 : i32
    %c0_i32_0 = arith.constant 0 : i32
    %c0_i32_1 = arith.constant 0 : i32
    return %c0_i32, %c0_i32_0 : i32, i32
  }
  func.func @transform_14(%arg0: i32) -> (i32, i32) {
    %c0_i32 = arith.constant 0 : i32
    %c0_i32_0 = arith.constant 0 : i32
    %c0_i32_1 = arith.constant 0 : i32
    return %c0_i32, %c0_i32_0 : i32, i32
  }
  func.func @transform_15(%arg0: i32) -> (i32, i32, i32) {
    %c0_i32 = arith.constant 0 : i32
    %c0_i32_0 = arith.constant 0 : i32
    %c0_i32_1 = arith.constant 0 : i32
    return %arg0, %c0_i32, %c0_i32_0 : i32, i32, i32
  }
  func.func @transform_16(%arg0: i32) -> (i32, i32, i32) {
    %c0_i32 = arith.constant 0 : i32
    %c0_i32_0 = arith.constant 0 : i32
    %c0_i32_1 = arith.constant 0 : i32
    return %arg0, %c0_i32, %c0_i32_0 : i32, i32, i32
  }
  func.func @transform_17(%arg0: i32) -> (i32, i32, i32) {
    %c0_i32 = arith.constant 0 : i32
    %c0_i32_0 = arith.constant 0 : i32
    %c0_i32_1 = arith.constant 0 : i32
    return %arg0, %c0_i32, %c0_i32_0 : i32, i32, i32
  }
}

</mosaic_0001>

<bundles_post_ra>
// kernel: tpu_custom_call.1
= control target key start
LH: loop header
LB: loop body
LE: loop exit
PB: predicated region body
PF: predicated region fallthrough
CT: control target
= control target key end

     0   :  { %s5901_s0 = inlined_call_operand.vmem [shape: f32[4,32,128], index: 0, kind: input, shape index: {}]   ;;  %s5902_s1 = inlined_call_operand.hbm [shape: s32[4,8,16], index: 1, kind: input, shape index: {}]   ;;  %s5903_s2 = inlined_call_operand.hbm [shape: f32[4,8,16], index: 2, kind: input, shape index: {}]   ;;  %s5904_s3 = inlined_call_operand.vmem [shape: bf16[128,128], index: 3, kind: input, shape index: {}]   ;;  %s5905_s4 = inlined_call_operand.vmem [shape: f32[1,128], index: 4, kind: input, shape index: {}]   ;;  %s5906_s5 = inlined_call_operand.vmem [shape: bf16[128,1], index: 5, kind: input, shape index: {}]   ;;  %s5907_s6 = inlined_call_operand.<no memory space> [shape: f32[1,1], index: 6, kind: input, shape index: {}]   ;;  %s5908_s7 = inlined_call_operand.hbm [shape: bf16[128,128], index: 7, kind: input, shape index: {}]   ;;  %s5909_s8 = inlined_call_operand.vmem [shape: f32[1,128], index: 8, kind: input, shape index: {}]   ;;  %s5910_s9 = inlined_call_operand.vmem [shape: bf16[128,2], index: 9, kind: input, shape index: {}]   ;;  %s5911_s10 = inlined_call_operand.vmem [shape: f32[1,2], index: 10, kind: input, shape index: {}]   ;;  %s5912_s11 = inlined_call_operand.hbm [shape: bf16[128,128], index: 11, kind: input, shape index: {}]   ;;  %s5913_s12 = inlined_call_operand.vmem [shape: f32[1,128], index: 12, kind: input, shape index: {}]   ;;  %s5914_s13 = inlined_call_operand.vmem [shape: bf16[128,3], index: 13, kind: input, shape index: {}]   ;;  %s5915_s14 = inlined_call_operand.vmem [shape: f32[1,3], index: 14, kind: input, shape index: {}]   ;;  %s5916_s15 = inlined_call_operand.vmem [shape: f32[4,8,2], index: 15, kind: output, shape index: {0}]   ;;  %s5917_s16 = inlined_call_operand.vmem [shape: f32[4,1,3], index: 16, kind: output, shape index: {1}]   ;;  %s5918_s17 = inlined_call_operand.hbm [shape: f32[4,1,128], index: 17, kind: output, shape index: {2}]  }
   0x1   :  { %5933 = sst [smem:[#allocation23_spill]] %s5901_s0  ;;  %v23_v0 = vstv %s5907_s6 }
   0x2   :  { %5934 = sst [smem:[#allocation24_spill]] %s5902_s1  ;;  %24 = vst [vmem:[#allocation2] sm:$0x1] %v23_v0 }
   0x3   :  { %5935 = sst [smem:[#allocation25_spill]] %s5908_s7 }
   0x4   :  { %5936 = sst [smem:[#allocation26_spill]] %s5912_s11 }
   0x5   :  { %5937 = sst [smem:[#allocation27_spill]] %s5915_s14 }
   0x6   :  { %5938 = sst [smem:[#allocation28_spill]] %s5917_s16 }
   0x7   :  { %5939 = sst [smem:[#allocation29_spill]] %s5918_s17 }
   0x8   :  { %25 = vsyncpa [#allocation4], 0 }
   0x9   :  { %27 = vsyncpa [#allocation4 + $0x1], 0 }
   0xa   :  { %28 = vsyncpa [#allocation7], 0 }
   0xb   :  { %30 = vsyncpa [#allocation7 + $0x1], 0 }
   0xc   :  { %31 = vsyncpa [#allocation10], 0 }
   0xd   :  { %32 = vsyncpa [#allocation5], 0 }
   0xe   :  { %34 = vsyncpa [#allocation5 + $0x1], 0  ;;  %s4966_s26 = smov 0   ;;  %s4968_s27 = smov 0  }
   0xf   :  { %s4970_s28 = smov 0   ;;  %s4972_s29 = smov 0  }
  0x10 LB: > { %5940 = sst [smem:[#allocation17_spill]] %s4843_s26  ;;  %s4987_s6 = sadd.s32 4294967295, %s4855_s29   ;;  %s4855_s29 = sphi %s4972_s29, %s5972_s29   ;;  %s4851_s28 = sphi %s4970_s28, %s5974_s28   ;;  %s4847_s27 = sphi %s4968_s27, %s5976_s27   ;;  %s4843_s26 = sphi %s4966_s26, %s5975_s26  }
  0x11   : > { %5941 = sst [smem:[#allocation18_spill]] %s4851_s28  ;;  %s3845_s0 = sadd.s32 4294967294, %s4855_s29  }
  0x12   : > { %p86_p0 = scmp.ne.s32.totalorder %s4847_s27, %s4843_s26  ;;  %p5921_p1 = scmp.eq.s32.totalorder %s4987_s6, 0 }
  0x13   : > { %p446_p3 = scmp.eq.s32.totalorder %s3845_s0, 1  ;;  %p3846_p5 = scmp.ge.s32.totalorder %s4855_s29, 1 }
  0x14   : > { %p4996_p4 = por %p5921_p1, %p86_p0  ;;  %p453_p7 = scmp.lt.s32.totalorder %s4855_s29, 3 }
  0x15   : > { %p5001_p6 = por %p446_p3, %p86_p0  ;;  %s4857_s1 = smov [#allocation8]  }
  0x16   : > { %s5942_s30 = scalar_select %p4996_p4, 1, 0 }
  0x17   : > { %s5943_s18 = scalar_select %p5001_p6, 1, 0 }
  0x18   : > { %p5006_p8 = pnand %p3846_p5, %p453_p7  ;;  %s477_s20 = sshll.u32 %s4857_s1, 4  ;;  %s478_s20 = int_to_ptr.vmem [resolvable:$true] %s477_s20 }
  0x19   : > { %5944 = sst [smem:[#allocation19_spill]] %s5943_s18  ;;  %s4858_s22 = smov [#allocation9]  }
  0x1a   : > { %p4466_p9 = pneg %p5006_p8  ;;  %s499_s23 = sshll.u32 %s4858_s22, 4  ;;  %s500_s23 = int_to_ptr.vmem [resolvable:$true] %s499_s23 }
  0x1b   : > { %s4682_s24 = scalar_lea.vmem %s478_s20, 1024  ;;  %p4690_p5 = scmp.lt.s32.totalorder %s478_s20, %s478_s20 }
  0x1c   : > { %p5015_p11 = pnand %p4466_p9, %p5921_p1  ;;  %p4683_p13 = scmp.ne.s32.totalorder %s478_s20, %s4682_s24 }
  0x1d   : > { %p4691_p7 = scmp.lt.s32.totalorder %s4682_s24, %s4682_s24 }
  0x1e   : > { %p4673_p12 = pneg %p5015_p11 }
  0x1f   : > { %p4692_p10 = por %p4691_p7, %p4690_p5 }
  0x20   : > { %p4685_p0 = pnand %p4683_p13, %p4673_p12 }
  0x22   : > { %p4686_p3 = pneg %p4685_p0 }
  0x24   : > { %p4693_p9 = pnand %p4692_p10, %p4686_p3 }
  0x26   : > { %4696 = shalt.err (!%p4693_p9)
}
  0x27   : > { %s4859_s25 = smov 64   ;;  %s4860_s0 = smov 4  }
  0x28   : > { %s5947_s7 = sld [smem:[#allocation25_spill]]  ;;  %s4708_s18 = scalar_lea.vmem %s500_s23, 1024 }
  0x29   : > { %p4709_p1 = scmp.ne.s32.totalorder %s500_s23, %s4708_s18  ;;  %p4716_p2 = scmp.lt.s32.totalorder %s500_s23, %s500_s23 }
  0x2a   : > { %p4717_p6 = scmp.lt.s32.totalorder %s4708_s18, %s4708_s18 }
  0x2b   : > { %p4711_p13 = pnand %p4709_p1, %p4673_p12 }
  0x2c   : > { %p4718_p5 = por %p4717_p6, %p4716_p2 }
  0x2d   : > { %p4712_p0 = pneg %p4711_p13 }
  0x2e   : > { %4469 = dma.hbm_to_vmem [thread:$0]  (!%p5015_p11), %s5947_s7, 1024, %s478_s20, [#allocation7], %s4859_s25, %s4859_s25, %s4860_s0  }
  0x2f   : > { %p4719_p10 = pnand %p4718_p5, %p4712_p0 }
  0x31   : > { %4722 = shalt.err (!%p4719_p10)
}
  0x32   : > { %s5948_s11 = sld [smem:[#allocation26_spill]]  ;;  %s5038_s18 = sadd.s32 1, %s4855_s29  }
  0x33   : > { %5949 = sst [smem:[#allocation20_spill]] %s5038_s18  ;;  %s73_s20 = sadd.s32 1, %s4851_s28 }
  0x34   : > { %s70_s21 = ssub.s32 %s4855_s29, %s5038_s18  ;;  %p80_p1 = scmp.ne.s32.totalorder %s4851_s28, %s4847_s27 }
  0x35   : > { %p71_p2 = scmp.eq.s32.totalorder %s70_s21, 0  ;;  %p81_p6 = scmp.eq.s32.totalorder %s4855_s29, 0 }
  0x36   : > { %p5950_p12 = scmp.eq.s32.totalorder %s4987_s6, 1  ;;  %p4486_p7 = scmp.lt.s32.totalorder %s4855_s29, 2 }
  0x37   : > { %s5054_s1 = scalar_select %p71_p2, %s4851_s28, %s73_s20  }
  0x38   : > { %4472 = dma.hbm_to_vmem [thread:$0]  (!%p5015_p11), %s5948_s11, 1024, %s500_s23, [#allocation10], %s4859_s25, %s4859_s25, %s4860_s0  }
  0x39   : > { %p5048_p3 = por %p5950_p12, %p80_p1  ;;  %5953 = sst [smem:[#allocation22_spill]] %s5054_s1 }
  0x3a   : > { %p82_p9 = por %p81_p6, %p80_p1  ;;  %s532_s22 = sand.u32 1, %s4851_s28  }
  0x3b   : > { %s5951_s26 = scalar_select %p5048_p3, 1, 0 }
  0x3c   : > { %s5057_s24 = sshll.u32 %s532_s22, 4  ;;  %s5926_s23 = sshll.u32 %s4855_s29, 8 }
  0x3d   : > { %5952 = sst [smem:[#allocation21_spill]] %s5951_s26  ;;  %s536_s11 = scalar_lea.vmem [#allocation3], %s5057_s24 }
  0x3e   : > { %s5954_s7 = sld [smem:[#allocation24_spill]]  ;;  %s543_s18 = sshll.u32 %s536_s11, 4  ;;  %s5068_s18 = int_to_ptr.vmem [resolvable:$true] %s543_s18 }
  0x3f   : > { %p5070_p11 = pnand %p4486_p7, %p82_p9  ;;  %s5074_s1 = scalar_lea.sflag [#allocation4], %s532_s22 }
  0x41   : > { %p4725_p0 = pneg %p5070_p11 }
  0x44   : > { %s5065_s21 = scalar_lea.hbm %s5954_s7, %s5926_s23  ;;  %s4728_s0 = scalar_lea.hbm %s5954_s7, 512 }
  0x45   : > { %s4723_s28 = scalar_lea.hbm %s5065_s21, 256  ;;  %p4729_p1 = scmp.lt.s32.totalorder %s5065_s21, %s5954_s7 }
  0x46   : > { %p4724_p13 = scmp.ne.s32.totalorder %s5065_s21, %s4723_s28  ;;  %p4730_p2 = scmp.lt.s32.totalorder %s4728_s0, %s4723_s28 }
  0x48   : > { %p4726_p5 = pnand %p4725_p0, %p4724_p13  ;;  %p4731_p6 = por %p4730_p2, %p4729_p1 }
  0x4a   : > { %p4727_p10 = pneg %p4726_p5 }
  0x4c   : > { %p4732_p12 = pnand %p4731_p6, %p4727_p10 }
  0x4e   : > { %4735 = shalt.err (!%p4732_p12)
}
  0x4f   : > { %s4736_s22 = scalar_lea.vmem %s5068_s18, 256  ;;  %s4861_s25 = smov [#allocation3]  }
  0x50   : > { %p4737_p7 = scmp.ne.s32.totalorder %s5068_s18, %s4736_s22  ;;  %s4741_s11 = sshll.u32 %s4861_s25, 4  ;;  %s4742_s11 = int_to_ptr.vmem [resolvable:$false] %s4741_s11 }
  0x51   : > { %s4743_s14 = scalar_lea.vmem %s4742_s11, 512  ;;  %p4744_p5 = scmp.lt.s32.totalorder %s5068_s18, %s4742_s11 }
  0x52   : > { %p4739_p9 = pnand %p4737_p7, %p4725_p0  ;;  %p4745_p3 = scmp.lt.s32.totalorder %s4743_s14, %s4736_s22 }
  0x54   : > { %p4740_p13 = pneg %p4739_p9  ;;  %p4746_p4 = por %p4745_p3, %p4744_p5 }
  0x56   : > { %p4747_p1 = pnand %p4746_p4, %p4740_p13 }
  0x58   : > { %4750 = shalt.err (!%p4747_p1)
}
  0x59   : > { %s4862_s16 = smov 128   ;;  %s4863_s28 = smov 8  }
  0x5a   : > { %4476 = dma.hbm_to_vmem [thread:$0]  (!%p5070_p11), %s5065_s21, 256, %s5068_s18, %s5074_s1, %s4862_s16, %s4862_s16, %s4863_s28  }
  0x5b   : > { %s5956_s23 = sshll.u32 %s4855_s29, 8  ;;  %s557_s25 = scalar_lea.vmem [#allocation6], %s5057_s24 }
  0x5c   : > { %s5109_s22 = scalar_lea.hbm %s5903_s2, %s5956_s23  ;;  %s564_s11 = sshll.u32 %s557_s25, 4  ;;  %s5112_s11 = int_to_ptr.vmem [resolvable:$true] %s564_s11 }
  0x5d   : > { %s553_s7 = sand.u32 1, %s4855_s29   ;;  %s4751_s26 = scalar_lea.hbm %s5109_s22, 256 }
  0x5e   : > { %s554_s17 = scalar_lea.sflag [#allocation7], %s553_s7  ;;  %p4752_p4 = scmp.ne.s32.totalorder %s5109_s22, %s4751_s26 }
  0x5f   : > { %s4756_s21 = scalar_lea.hbm %s5903_s2, 512  ;;  %p4757_p2 = scmp.lt.s32.totalorder %s5109_s22, %s5903_s2 }
  0x60   : > { %p4754_p3 = pnand %p4752_p4, %p4725_p0  ;;  %p4758_p6 = scmp.lt.s32.totalorder %s4756_s21, %s4751_s26 }
  0x62   : > { %p4755_p10 = pneg %p4754_p3  ;;  %p4759_p12 = por %p4758_p6, %p4757_p2 }
  0x64   : > { %p4760_p7 = pnand %p4759_p12, %p4755_p10 }
  0x66   : > { %4763 = shalt.err (!%p4760_p7)
}
  0x67   : > { %s4764_s7 = scalar_lea.vmem %s5112_s11, 256  ;;  %s4864_s24 = smov [#allocation6]  }
  0x68   : > { %p4765_p9 = scmp.ne.s32.totalorder %s5112_s11, %s4764_s7  ;;  %s4769_s0 = sshll.u32 %s4864_s24, 4  ;;  %s4770_s0 = int_to_ptr.vmem [resolvable:$false] %s4769_s0 }
  0x69   : > { %s4771_s25 = scalar_lea.vmem %s4770_s0, 512  ;;  %p4772_p1 = scmp.lt.s32.totalorder %s5112_s11, %s4770_s0 }
  0x6a   : > { %p4767_p13 = pnand %p4765_p9, %p4725_p0  ;;  %p4773_p4 = scmp.lt.s32.totalorder %s4771_s25, %s4764_s7 }
  0x6c   : > { %p4768_p5 = pneg %p4767_p13  ;;  %p4774_p3 = por %p4773_p4, %p4772_p1 }
  0x6e   : > { %p4775_p2 = pnand %p4774_p3, %p4768_p5 }
  0x70   : > { %4778 = shalt.err (!%p4775_p2)
}
  0x71   : > { %4479 = dma.hbm_to_vmem [thread:$0]  (!%p5070_p11), %s5109_s22, 256, %s5112_s11, %s554_s17, %s4862_s16, %s4862_s16, %s4863_s28  }
  0x72   : > { %576 = sbr.rel (%p5006_p8) target bundleno = 2925 (0xb6d), region = 80  ;;  %s5143_s26 = sand.u32 (!%p5006_p8), 1, %s4847_s27  }
  0x73   : > { %s3857_s18 = sshll.u32 (!%p5006_p8), %s5143_s26, 4  ;;  %s579_s1 = scalar_lea.sflag (!%p5006_p8), [#allocation4], %s5143_s26 }
  0x74   : > { %s5147_s21 = scalar_lea.vmem (!%p5006_p8), [#allocation3], %s3857_s18  ;;  %p5957_p0 = scmp.ne.s32.totalorder (!%p5006_p8), %s5942_s30, 0 }
  0x77   : > { %4822 = dma.done.wait (%p5957_p0), %s579_s1, 256  }
  0x78   : > { %4824 = vsyncadd (%p5957_p0), %s579_s1, 4294967040  ;;  %s587_s17 = sand.u32 1, %s4987_s6   ;;  %s5154_s20 = scalar_lea.vmem [#allocation6], %s3857_s18 }
  0x79   : > { %s588_s19 = scalar_lea.sflag [#allocation7], %s587_s17 }
  0x7a   : > { %4826 = dma.done.wait (%p5957_p0), %s588_s19, 256  }
  0x7b   : > { %4828 = vsyncadd (%p5957_p0), %s588_s19, 4294967040  ;;  %p5958_p8 = scmp.eq.s32.totalorder %s4987_s6, 0 }
  0x7d   : > { %4830 = dma.done.wait (%p5958_p8), [#allocation7], 1024   ;;  %p5959_p11 = pmov %p5958_p8 }
  0x7e   : > { %p5960_p10 = pmov %p5958_p8 }
  0x7f   : > { %4832 = vsyncadd (%p5959_p11), [#allocation7], 4294966272 }
  0x80   : > { %4834 = dma.done.wait (%p5960_p10), [#allocation10], 1024   ;;  %p5961_p6 = pmov %p5958_p8 }
  0x81   : > { %v706_v1 = vlaneseq  ;;  %s3862_s16 = sshll.u32 %s4987_s6, 1  ;;  %s5962_s11 = sld [smem:[#allocation23_spill]]  ;;  %v704_v5 = vld [vmem:[%s5147_s21] sm:$0xff]  ;;  %v705_v31 = vld [vmem:[%s5147_s21 + $0x8] sm:$0xff]  ;;  %vm996_vm4 = vcmask 261120   ;;  %v4865_v47 = vmov 0.0  }
  0x82   : > { %4836 = vsyncadd (%p5961_p6), [#allocation10], 4294966272  ;;  %p671_p12 = scmp.lt.s32.totalorder %s3862_s16, 3  ;;  %v4537_v39 = vld [vmem:[%s5904_s3 + $0x38] sm:$0xff]   ;;  %v4538_v56 = vld [vmem:[%s5904_s3 + $0x30] sm:$0xff]   ;;  %s4869_s28 = smov 1  }
  0x83   : > { %v5170_v2 = vshrl.u32 %v706_v1, 7  ;;  %v5218_v42 = vand.u32 127, %v706_v1  ;;  %v4539_v62 = vld [vmem:[%s5904_s3 + $0x28] sm:$0xff]   ;;  %s4870_s22 = smov 127   ;;  %s5963_s0 = sld [smem:[#allocation21_spill]] }
  0x84   : > { %s5978_s16 = smov (!%p671_p12, %s3862_s16), 3  ;;  %s5964_s17 = sld [smem:[#allocation29_spill]] }
  0x85   : > { %v5175_v3 = vsub.s32 0, %v5170_v2  ;;  %v721_v4 = vsub.s32 1, %v5170_v2  ;;  %s4002_s30 = sshll.u32 %s5978_s16, 5  ;;  %v732_v6 = vsub.s32 2, %v5170_v2  ;;  %v743_v7 = vsub.s32 3, %v5170_v2  ;;  %s3866_s18 = sshll.u32 %s5978_s16, 3 }
  0x86   : > { %v754_v8 = vsub.s32 4, %v5170_v2  ;;  %v765_v9 = vsub.s32 5, %v5170_v2  ;;  %v776_v13 = vsub.s32 6, %v5170_v2  ;;  %v787_v14 = vsub.s32 7, %v5170_v2 }
  0x87   : > { %s5182_s23 = scalar_lea.vmem %s5962_s11, %s4002_s30  ;;  %v722_v11 = vrot.slane %v704_v5, %v721_v4  ;;  %v711_v12 = vrot.slane %v704_v5, %v5175_v3  ;;  %v733_v20 = vrot.slane %v704_v5, %v732_v6  ;;  %v744_v21 = vrot.slane %v704_v5, %v743_v7  ;;  %s683_s30 = scalar_lea.vmem %s5916_s15, %s3866_s18 }
  0x88   : > { %v694_v10 = vld [vmem:[%s5182_s23 + $0x10] sm:$0xff]  ;;  %v695_v15 = vld [vmem:[%s5182_s23 + $0x18] sm:$0xff]  ;;  %v692_v16 = vld [vmem:[%s5182_s23] sm:$0xff]  ;;  %v755_v22 = vrot.slane %v704_v5, %v754_v8  ;;  %v766_v23 = vrot.slane %v704_v5, %v765_v9  ;;  %v777_v27 = vrot.slane %v704_v5, %v776_v13  ;;  %v788_v32 = vrot.slane %v704_v5, %v787_v14  ;;  %s4003_s18 = sshll.u32 %s4987_s6, 5  ;;  %s4871_s11 = smov [#allocation11]  }
  0x89   : > { %v693_v17 = vld [vmem:[%s5182_s23 + $0x8] sm:$0xff]  ;;  %724 = vbcast.lane.b32.xlu1 %v722_v11, 256  ;;  %713 = vbcast.lane.b32.xlu0 %v711_v12, 256  ;;  %v701_v18 = vpack.c.bf16 %v695_v15, %v694_v10  ;;  %v698_v24 = vld [vmem:[%s5182_s23 + $0x30] sm:$0xff]  ;;  %v699_v25 = vld [vmem:[%s5182_s23 + $0x38] sm:$0xff]  ;;  %v799_v33 = vrot.slane %v705_v31, %v5175_v3  ;;  %v810_v34 = vrot.slane %v705_v31, %v721_v4  ;;  %p5965_p9 = scmp.ne.s32.totalorder %s5963_s0, 0 }
  0x8a   : > { %v700_v19 = vpack.c.bf16 %v693_v17, %v692_v16  ;;  %v703_v26 = vpack.c.bf16 %v699_v25, %v698_v24  ;;  %v696_v28 = vld [vmem:[%s5182_s23 + $0x20] sm:$0xff]  ;;  %v697_v29 = vld [vmem:[%s5182_s23 + $0x28] sm:$0xff]  ;;  %v821_v35 = vrot.slane %v705_v31, %v732_v6  ;;  %v832_v36 = vrot.slane %v705_v31, %v743_v7  ;;  %s5845_s19 = scalar_lea.hbm %s5964_s17, %s4003_s18  ;;  %s4783_s23 = sshll.u32 %s4871_s11, 4  ;;  %s4784_s23 = int_to_ptr.vmem [resolvable:$false] %s4783_s23 }
  0x8b   : > { %4140 = vmatprep.subr.bf16.mxu0 %v701_v18  ;;  %v702_v30 = vpack.c.bf16 %v697_v29, %v696_v28  ;;  %v843_v37 = vrot.slane %v705_v31, %v754_v8  ;;  %v854_v38 = vrot.slane %v705_v31, %v765_v9  ;;  %v865_v40 = vrot.slane %v705_v31, %v776_v13  ;;  %v4540_v6 = vld [vmem:[%s5904_s3 + $0x20] sm:$0xff]   ;;  %s4785_s6 = scalar_lea.vmem %s4784_s23, 64 }
  0x8c   : > { %4141 = vmatpush3.bf16.msra.mxu0 %v701_v18  ;;  %4160 = vmatprep.subr.bf16.mxu1 %v703_v26  ;;  %v876_v41 = vrot.slane %v705_v31, %v787_v14  ;;  %v4542_v18 = vld [vmem:[%s5904_s3 + $0x10] sm:$0xff]  }
  0x8d   : > { %728 = vbcast.lane.b32.xlu1 %v722_v11, 264  ;;  %717 = vbcast.lane.b32.xlu0 %v711_v12, 264  ;;  %v4541_v12 = vld [vmem:[%s5904_s3 + $0x18] sm:$0xff]  }
  0x8e   : > { %4142 = vmatprep.subr.bf16.mxu0 %v700_v19  ;;  %4161 = vmatpush3.bf16.msra.mxu1 %v703_v26 }
  0x8f   : > { %4162 = vmatprep.subr.bf16.mxu1 %v702_v30 }
  0x90   : > { %4143 = vmatpush3.bf16.msra.mxu0 %v700_v19 }
  0x91   : > { %739 = vbcast.lane.b32.xlu1 %v733_v20, 264  ;;  %735 = vbcast.lane.b32.xlu0 %v733_v20, 256 }
  0x92   : > { %4163 = vmatpush3.bf16.msra.mxu1 %v702_v30  ;;  %4180 = vmatprep.subr.bf16.mxu0 %v4537_v39 }
  0x95   : > { %750 = vbcast.lane.b32.xlu1 %v744_v21, 264  ;;  %746 = vbcast.lane.b32.xlu0 %v744_v21, 256 }
  0x99   : > { %761 = vbcast.lane.b32.xlu1 %v755_v22, 264  ;;  %757 = vbcast.lane.b32.xlu0 %v755_v22, 256 }
  0x9d   : > { %772 = vbcast.lane.b32.xlu1 %v766_v23, 264  ;;  %768 = vbcast.lane.b32.xlu0 %v766_v23, 256 }
  0xa1   : > { %783 = vbcast.lane.b32.xlu1 %v777_v27, 264  ;;  %779 = vbcast.lane.b32.xlu0 %v777_v27, 256 }
  0xa5   : > { %794 = vbcast.lane.b32.xlu1 %v788_v32, 264  ;;  %790 = vbcast.lane.b32.xlu0 %v788_v32, 256 }
  0xa9   : > { %805 = vbcast.lane.b32.xlu1 %v799_v33, 264  ;;  %801 = vbcast.lane.b32.xlu0 %v799_v33, 256 }
  0xad   : > { %816 = vbcast.lane.b32.xlu1 %v810_v34, 264  ;;  %812 = vbcast.lane.b32.xlu0 %v810_v34, 256 }
  0xb1   : > { %827 = vbcast.lane.b32.xlu1 %v821_v35, 264  ;;  %823 = vbcast.lane.b32.xlu0 %v821_v35, 256 }
  0xb5   : > { %838 = vbcast.lane.b32.xlu1 %v832_v36, 264  ;;  %834 = vbcast.lane.b32.xlu0 %v832_v36, 256 }
  0xb9   : > { %849 = vbcast.lane.b32.xlu1 %v843_v37, 264  ;;  %845 = vbcast.lane.b32.xlu0 %v843_v37, 256 }
  0xbd   : > { %860 = vbcast.lane.b32.xlu1 %v854_v38, 264  ;;  %856 = vbcast.lane.b32.xlu0 %v854_v38, 256 }
  0xc1   : > { %871 = vbcast.lane.b32.xlu1 %v865_v40, 264  ;;  %867 = vbcast.lane.b32.xlu0 %v865_v40, 256 }
  0xc5   : > { %882 = vbcast.lane.b32.xlu1 %v876_v41, 264  ;;  %878 = vbcast.lane.b32.xlu0 %v876_v41, 256 }
  0xfb   : > { %v725_v43 = vpop.permute.xlu1 %724  ;;  %v714_v44 = vpop.permute.xlu0 %713 }
  0xfc   : > { %vm886_vm0 = vcmp.eq.s32.totalorder %v725_v43, %v5218_v42  ;;  %vm884_vm1 = vcmp.eq.s32.totalorder %v714_v44, %v5218_v42 }
  0xfd   : > { %v3870_v48 = vsel %vm886_vm0, 1.0, %v4865_v47  ;;  %v3868_v49 = vsel %vm884_vm1, 1.0, %v4865_v47 }
  0xff   : > { %v729_v45 = vpop.permute.xlu1 %728  ;;  %v718_v46 = vpop.permute.xlu0 %717 }
 0x100   : > { %vm887_vm2 = vcmp.eq.s32.totalorder %v729_v45, %v5218_v42  ;;  %vm885_vm3 = vcmp.eq.s32.totalorder %v718_v46, %v5218_v42 }
 0x101   : > { %v3871_v50 = vsel %vm887_vm2, 1.0, %v4865_v47  ;;  %v3869_v51 = vsel %vm885_vm3, 1.0, %v4865_v47 }
 0x102   : > { %v981_v52 = vpack.c.bf16 %v3871_v50, %v3870_v48  ;;  %v980_v53 = vpack.c.bf16 %v3869_v51, %v3868_v49 }
 0x103   : > { %v740_v54 = vpop.permute.xlu1 %739  ;;  %v736_v55 = vpop.permute.xlu0 %735 }
 0x104   : > { %vm889_vm5 = vcmp.eq.s32.totalorder %v740_v54, %v5218_v42  ;;  %vm888_vm6 = vcmp.eq.s32.totalorder %v736_v55, %v5218_v42  ;;  %4144 = vmatprep.mubr.msk.bf16.mxu0 %vm996_vm4, %v980_v53 }
 0x105   : > { %v3873_v57 = vsel %vm889_vm5, 1.0, %v4865_v47  ;;  %v3872_v58 = vsel %vm888_vm6, 1.0, %v4865_v47  ;;  %4145 = vmatmul.mubr.msk.bf16.vlgmr.msra.gmra.mxu0 %vm996_vm4, %v981_v52 }
 0x106   : > { %v982_v59 = vpack.c.bf16 %v3873_v57, %v3872_v58  ;;  %4181 = vmatpush3.bf16.msra.mxu0 %v4537_v39 }
 0x107   : > { %v751_v60 = vpop.permute.xlu1 %750  ;;  %v747_v61 = vpop.permute.xlu0 %746  ;;  %4182 = vmatprep.subr.bf16.mxu0 %v4538_v56 }
 0x108   : > { %vm891_vm7 = vcmp.eq.s32.totalorder %v751_v60, %v5218_v42  ;;  %vm890_vm8 = vcmp.eq.s32.totalorder %v747_v61, %v5218_v42  ;;  %4148 = vmatprep.mubr.msk.bf16.mxu0 %vm996_vm4, %v982_v59 }
 0x109   : > { %v3875_v63 = vsel %vm891_vm7, 1.0, %v4865_v47  ;;  %v3874_v0 = vsel %vm890_vm8, 1.0, %v4865_v47 }
 0x10a   : > { %v983_v1 = vpack.c.bf16 %v3875_v63, %v3874_v0  ;;  %4183 = vmatpush3.bf16.msra.mxu0 %v4538_v56 }
 0x10b   : > { %v762_v4 = vpop.permute.xlu1 %761  ;;  %v758_v5 = vpop.permute.xlu0 %757  ;;  %4184 = vmatprep.subr.bf16.mxu0 %v4539_v62 }
 0x10c   : > { %vm893_vm9 = vcmp.eq.s32.totalorder %v762_v4, %v5218_v42  ;;  %vm892_vm10 = vcmp.eq.s32.totalorder %v758_v5, %v5218_v42 }
 0x10d   : > { %v3877_v7 = vsel %vm893_vm9, 1.0, %v4865_v47  ;;  %v3876_v8 = vsel %vm892_vm10, 1.0, %v4865_v47  ;;  %4149 = vmatmul.mubr.msk.bf16.gmra.mxu0 %vm996_vm4, %v983_v1 }
 0x10e   : > { %v984_v9 = vpack.c.bf16 %v3877_v7, %v3876_v8  ;;  %4185 = vmatpush3.bf16.msra.mxu0 %v4539_v62  ;;  %v4543_v7 = vld [vmem:[%s5904_s3 + $0x8] sm:$0xff]   ;;  %v4544_v8 = vld [vmem:[%s5904_s3] sm:$0xff]  }
 0x10f   : > { %v773_v10 = vpop.permute.xlu1 %772  ;;  %v769_v11 = vpop.permute.xlu0 %768  ;;  %4186 = vmatprep.subr.bf16.mxu0 %v4540_v6 }
 0x110   : > { %vm895_vm11 = vcmp.eq.s32.totalorder %v773_v10, %v5218_v42  ;;  %vm894_vm12 = vcmp.eq.s32.totalorder %v769_v11, %v5218_v42  ;;  %4152 = vmatprep.mubr.msk.bf16.mxu0 %vm996_vm4, %v984_v9  ;;  %v4545_v9 = vld [vmem:[%s5906_s5 + $0x38] sm:$0xff]   ;;  %v4546_v10 = vld [vmem:[%s5906_s5 + $0x30] sm:$0xff]  }
 0x111   : > { %v3879_v13 = vsel %vm895_vm11, 1.0, %v4865_v47  ;;  %v3878_v14 = vsel %vm894_vm12, 1.0, %v4865_v47  ;;  %4228 = vmatprep.subr.bf16.mxu1 %v4545_v9 }
 0x112   : > { %v985_v15 = vpack.c.bf16 %v3879_v13, %v3878_v14  ;;  %4187 = vmatpush3.bf16.msra.mxu0 %v4540_v6 }
 0x113   : > { %v784_v16 = vpop.permute.xlu1 %783  ;;  %v780_v17 = vpop.permute.xlu0 %779  ;;  %4188 = vmatprep.subr.bf16.mxu0 %v4541_v12 }
 0x114   : > { %vm897_vm13 = vcmp.eq.s32.totalorder %v784_v16, %v5218_v42  ;;  %vm896_vm14 = vcmp.eq.s32.totalorder %v780_v17, %v5218_v42 }
 0x115   : > { %v3881_v19 = vsel %vm897_vm13, 1.0, %v4865_v47  ;;  %v3880_v20 = vsel %vm896_vm14, 1.0, %v4865_v47  ;;  %4153 = vmatmul.mubr.msk.bf16.gmra.mxu0 %vm996_vm4, %v985_v15 }
 0x116   : > { %v986_v21 = vpack.c.bf16 %v3881_v19, %v3880_v20  ;;  %4189 = vmatpush3.bf16.msra.mxu0 %v4541_v12 }
 0x117   : > { %v795_v22 = vpop.permute.xlu1 %794  ;;  %v791_v23 = vpop.permute.xlu0 %790  ;;  %4190 = vmatprep.subr.bf16.mxu0 %v4542_v18 }
 0x118   : > { %vm899_vm15 = vcmp.eq.s32.totalorder %v795_v22, %v5218_v42  ;;  %vm898_vm0 = vcmp.eq.s32.totalorder %v791_v23, %v5218_v42  ;;  %4156 = vmatprep.mubr.msk.bf16.mxu0 %vm996_vm4, %v986_v21 }
 0x119   : > { %v3883_v24 = vsel %vm899_vm15, 1.0, %v4865_v47  ;;  %v3882_v25 = vsel %vm898_vm0, 1.0, %v4865_v47 }
 0x11a   : > { %v987_v26 = vpack.c.bf16 %v3883_v24, %v3882_v25  ;;  %4191 = vmatpush3.bf16.msra.mxu0 %v4542_v18 }
 0x11b   : > { %v806_v27 = vpop.permute.xlu1 %805  ;;  %v802_v28 = vpop.permute.xlu0 %801  ;;  %4192 = vmatprep.subr.bf16.mxu0 %v4543_v7 }
 0x11c   : > { %vm901_vm1 = vcmp.eq.s32.totalorder %v806_v27, %v5218_v42  ;;  %vm900_vm2 = vcmp.eq.s32.totalorder %v802_v28, %v5218_v42 }
 0x11d   : > { %v3885_v29 = vsel %vm901_vm1, 1.0, %v4865_v47  ;;  %v3884_v30 = vsel %vm900_vm2, 1.0, %v4865_v47  ;;  %4157 = vmatmul.mubr.msk.bf16.gmra.mxu0 %vm996_vm4, %v987_v26  ;;  %vm2045_vm2 = vcmask 1041409  }
 0x11e   : > { %v988_v31 = vpack.c.bf16 %v3885_v29, %v3884_v30  ;;  %4193 = vmatpush3.bf16.msra.mxu0 %v4543_v7 }
 0x11f   : > { %v817_v32 = vpop.permute.xlu1 %816  ;;  %v813_v33 = vpop.permute.xlu0 %812  ;;  %4194 = vmatprep.subr.bf16.mxu0 %v4544_v8 }
 0x120   : > { %vm903_vm3 = vcmp.eq.s32.totalorder %v817_v32, %v5218_v42  ;;  %vm902_vm5 = vcmp.eq.s32.totalorder %v813_v33, %v5218_v42  ;;  %4164 = vmatprep.mubr.msk.bf16.mxu1 %vm996_vm4, %v988_v31 }
 0x121   : > { %v3887_v34 = vsel %vm903_vm3, 1.0, %v4865_v47  ;;  %v3886_v35 = vsel %vm902_vm5, 1.0, %v4865_v47  ;;  %vm2047_vm3 = vcmask 1042434   ;;  %vm2049_vm5 = vcmask 1043459  }
 0x122   : > { %v989_v36 = vpack.c.bf16 %v3887_v34, %v3886_v35  ;;  %4195 = vmatpush3.bf16.msra.mxu0 %v4544_v8 }
 0x123   : > { %v828_v37 = vpop.permute.xlu1 %827  ;;  %v824_v38 = vpop.permute.xlu0 %823  ;;  %4276 = vmatprep.subr.bf16.mxu0 %v4865_v47 }
 0x124   : > { %vm905_vm6 = vcmp.eq.s32.totalorder %v828_v37, %v5218_v42  ;;  %vm904_vm7 = vcmp.eq.s32.totalorder %v824_v38, %v5218_v42  ;;  %4165 = vmatmul.mubr.msk.bf16.vlgmr.msra.gmra.mxu1 %vm996_vm4, %v989_v36 }
 0x125   : > { %v3889_v39 = vsel %vm905_vm6, 1.0, %v4865_v47  ;;  %v3888_v40 = vsel %vm904_vm7, 1.0, %v4865_v47  ;;  %4229 = vmatpush3.bf16.msra.mxu1 %v4545_v9  ;;  %vm2051_vm6 = vcmask 1044484   ;;  %vm2053_vm7 = vcmask 1045509  }
 0x126   : > { %v990_v41 = vpack.c.bf16 %v3889_v39, %v3888_v40  ;;  %4230 = vmatprep.subr.bf16.mxu1 %v4546_v10 }
 0x127   : > { %v839_v43 = vpop.permute.xlu1 %838  ;;  %v835_v44 = vpop.permute.xlu0 %834 }
 0x128   : > { %vm907_vm8 = vcmp.eq.s32.totalorder %v839_v43, %v5218_v42  ;;  %vm906_vm9 = vcmp.eq.s32.totalorder %v835_v44, %v5218_v42  ;;  %4168 = vmatprep.mubr.msk.bf16.mxu1 %vm996_vm4, %v990_v41 }
 0x129   : > { %v3891_v45 = vsel %vm907_vm8, 1.0, %v4865_v47  ;;  %v3890_v46 = vsel %vm906_vm9, 1.0, %v4865_v47  ;;  %4231 = vmatpush3.bf16.msra.mxu1 %v4546_v10  ;;  %vm2055_vm8 = vcmask 1046534   ;;  %vm2057_vm9 = vcmask 1047559  }
 0x12a   : > { %v991_v48 = vpack.c.bf16 %v3891_v45, %v3890_v46 }
 0x12b   : > { %v850_v49 = vpop.permute.xlu1 %849  ;;  %v846_v50 = vpop.permute.xlu0 %845 }
 0x12c   : > { %vm909_vm10 = vcmp.eq.s32.totalorder %v850_v49, %v5218_v42  ;;  %vm908_vm11 = vcmp.eq.s32.totalorder %v846_v50, %v5218_v42  ;;  %4169 = vmatmul.mubr.msk.bf16.gmra.mxu1 %vm996_vm4, %v991_v48 }
 0x12d   : > { %v3893_v51 = vsel %vm909_vm10, 1.0, %v4865_v47  ;;  %v3892_v52 = vsel %vm908_vm11, 1.0, %v4865_v47  ;;  %vm2070_vm11 = vcmask 130048  }
 0x12e   : > { %v992_v53 = vpack.c.bf16 %v3893_v51, %v3892_v52 }
 0x12f   : > { %v861_v54 = vpop.permute.xlu1 %860  ;;  %v857_v55 = vpop.permute.xlu0 %856 }
 0x130   : > { %vm911_vm12 = vcmp.eq.s32.totalorder %v861_v54, %v5218_v42  ;;  %vm910_vm13 = vcmp.eq.s32.totalorder %v857_v55, %v5218_v42  ;;  %4172 = vmatprep.mubr.msk.bf16.mxu1 %vm996_vm4, %v992_v53 }
 0x131   : > { %v3895_v56 = vsel %vm911_vm12, 1.0, %v4865_v47  ;;  %v3894_v57 = vsel %vm910_vm13, 1.0, %v4865_v47  ;;  %vm4867_vm13 = vmmov 0  }
 0x132   : > { %v993_v58 = vpack.c.bf16 %v3895_v56, %v3894_v57 }
 0x133   : > { %v872_v59 = vpop.permute.xlu1 %871  ;;  %v868_v60 = vpop.permute.xlu0 %867 }
 0x134   : > { %vm913_vm14 = vcmp.eq.s32.totalorder %v872_v59, %v5218_v42  ;;  %vm912_vm15 = vcmp.eq.s32.totalorder %v868_v60, %v5218_v42  ;;  %4173 = vmatmul.mubr.msk.bf16.gmra.mxu1 %vm996_vm4, %v993_v58 }
 0x135   : > { %v3897_v61 = vsel %vm913_vm14, 1.0, %v4865_v47  ;;  %v3896_v62 = vsel %vm912_vm15, 1.0, %v4865_v47 }
 0x136   : > { %v994_v63 = vpack.c.bf16 %v3897_v61, %v3896_v62  ;;  %v4547_v61 = vld [vmem:[%s5906_s5 + $0x28] sm:$0xff]   ;;  %v4548_v62 = vld [vmem:[%s5906_s5 + $0x20] sm:$0xff]  }
 0x137   : > { %v883_v0 = vpop.permute.xlu1 %882  ;;  %v879_v1 = vpop.permute.xlu0 %878  ;;  %4232 = vmatprep.subr.bf16.mxu1 %v4547_v61 }
 0x138   : > { %vm915_vm0 = vcmp.eq.s32.totalorder %v883_v0, %v5218_v42  ;;  %vm914_vm1 = vcmp.eq.s32.totalorder %v879_v1, %v5218_v42  ;;  %4176 = vmatprep.mubr.msk.bf16.mxu1 %vm996_vm4, %v994_v63  ;;  %4233 = vmatpush3.bf16.msra.mxu1 %v4547_v61  ;;  %v4549_v63 = vld [vmem:[%s5906_s5 + $0x18] sm:$0xff]   ;;  %v4550_v0 = vld [vmem:[%s5906_s5 + $0x10] sm:$0xff]   ;;  %v4551_v1 = vld [vmem:[%s5906_s5 + $0x8] sm:$0xff]  }
 0x139   : > { %v3899_v4 = vsel %vm915_vm0, 1.0, %v4865_v47  ;;  %v3898_v5 = vsel %vm914_vm1, 1.0, %v4865_v47  ;;  %4234 = vmatprep.subr.bf16.mxu1 %v4548_v62  ;;  %vm3239_vm0 = vcmask 15360  }
 0x13a   : > { %v995_v6 = vpack.c.bf16 %v3899_v4, %v3898_v5  ;;  %v4552_v4 = vld [vmem:[%s5906_s5] sm:$0xff]  }
 0x13c   : > { %4177 = vmatmul.mubr.msk.bf16.gmra.mxu1 %vm996_vm4, %v995_v6  ;;  %v5396_v6 = vld [vmem:[%s5905_s4] ss:$0 sm:$0xff]  ;;  %vm1908_vm4 = vcmask 130112  }
 0x13d   : > { %4235 = vmatpush3.bf16.msra.mxu1 %v4548_v62 }
 0x13e   : > { %4236 = vmatprep.subr.bf16.mxu1 %v4549_v63 }
 0x141   : > { %4237 = vmatpush3.bf16.msra.mxu1 %v4549_v63 }
 0x142   : > { %4238 = vmatprep.subr.bf16.mxu1 %v4550_v0 }
 0x145   : > { %4239 = vmatpush3.bf16.msra.mxu1 %v4550_v0 }
 0x146   : > { %4240 = vmatprep.subr.bf16.mxu1 %v4551_v1 }
 0x149   : > { %4241 = vmatpush3.bf16.msra.mxu1 %v4551_v1 }
 0x14a   : > { %4242 = vmatprep.subr.bf16.mxu1 %v4552_v4 }
 0x14d   : > { %4243 = vmatpush3.bf16.msra.mxu1 %v4552_v4 }
 0x14e   : > { %4282 = vmatprep.subr.bf16.mxu1 %v4865_v47 }
 0x1c5   : > { %v4146_v11 = vpop.f32.mrf.mxu0 }
 0x1c7   : > { %v1055_v12 = vpop.f32.mrf.mxu0 }
 0x1c9   : > { %v4147_v13 = vpop.f32.mrf.mxu0 }
 0x1ca   : > { %v5328_v16 = vpack.c.bf16 %v4147_v13, %v4146_v11 }
 0x1cb   : > { %v1058_v14 = vpop.f32.mrf.mxu0 }
 0x1cc   : > { %v1239_v15 = vpack.c.bf16 %v1058_v14, %v1055_v12 }
 0x1cd   : > { %v4150_v17 = vpop.f32.mrf.mxu0 }
 0x1ce   : > { %4196 = vmatprep.mubr.bf16.mxu0 %v1239_v15 }
 0x1cf   : > { %v1071_v18 = vpop.f32.mrf.mxu0  ;;  %4197 = vmatmul.mubr.bf16.vlgmr.msra.gmra.mxu0 %v5328_v16 }
 0x1d0   : > { %4277 = vmatpush3.bf16.msra.mxu0 %v1239_v15 }
 0x1d1   : > { %v4151_v19 = vpop.f32.mrf.mxu0  ;;  %4288 = vmatprep.subr.bf16.mxu0 %v4865_v47 }
 0x1d2   : > { %v5334_v22 = vpack.c.bf16 %v4151_v19, %v4150_v17 }
 0x1d3   : > { %v1074_v20 = vpop.f32.mrf.mxu0 }
 0x1d4   : > { %v5332_v21 = vpack.c.bf16 %v1074_v20, %v1071_v18 }
 0x1d5   : > { %v4154_v23 = vpop.f32.mrf.mxu0 }
 0x1d6   : > { %4200 = vmatprep.mubr.bf16.mxu0 %v5332_v21 }
 0x1d7   : > { %v1087_v24 = vpop.f32.mrf.mxu0  ;;  %4201 = vmatmul.mubr.bf16.gmra.mxu0 %v5334_v22 }
 0x1d9   : > { %v4155_v25 = vpop.f32.mrf.mxu0 }
 0x1da   : > { %v5340_v28 = vpack.c.bf16 %v4155_v25, %v4154_v23 }
 0x1db   : > { %v1090_v26 = vpop.f32.mrf.mxu0 }
 0x1dc   : > { %v5338_v27 = vpack.c.bf16 %v1090_v26, %v1087_v24 }
 0x1dd   : > { %v4158_v29 = vpop.f32.mrf.mxu0 }
 0x1de   : > { %4204 = vmatprep.mubr.bf16.mxu0 %v5338_v27 }
 0x1df   : > { %v1103_v30 = vpop.f32.mrf.mxu0  ;;  %4205 = vmatmul.mubr.bf16.gmra.mxu0 %v5340_v28 }
 0x1e1   : > { %v4159_v31 = vpop.f32.mrf.mxu0 }
 0x1e2   : > { %v5346_v35 = vpack.c.bf16 %v4159_v31, %v4158_v29 }
 0x1e3   : > { %v1106_v32 = vpop.f32.mrf.mxu0 }
 0x1e4   : > { %v5344_v33 = vpack.c.bf16 %v1106_v32, %v1103_v30  ;;  %v4166_v34 = vpop.f32.mrf.mxu1 }
 0x1e6   : > { %v1176_v36 = vpop.f32.mrf.mxu1  ;;  %4208 = vmatprep.mubr.bf16.mxu0 %v5344_v33 }
 0x1e7   : > { %4209 = vmatmul.mubr.bf16.gmra.mxu0 %v5346_v35 }
 0x1e8   : > { %v4167_v37 = vpop.f32.mrf.mxu1 }
 0x1e9   : > { %v5352_v41 = vpack.c.bf16 %v4167_v37, %v4166_v34 }
 0x1ea   : > { %v1179_v38 = vpop.f32.mrf.mxu1 }
 0x1eb   : > { %v5350_v39 = vpack.c.bf16 %v1179_v38, %v1176_v36 }
 0x1ec   : > { %v4170_v40 = vpop.f32.mrf.mxu1 }
 0x1ed   : > { %4212 = vmatprep.mubr.bf16.mxu0 %v5350_v39 }
 0x1ee   : > { %v1192_v43 = vpop.f32.mrf.mxu1 }
 0x1ef   : > { %4213 = vmatmul.mubr.bf16.gmra.mxu0 %v5352_v41 }
 0x1f0   : > { %v4171_v44 = vpop.f32.mrf.mxu1 }
 0x1f1   : > { %v5358_v49 = vpack.c.bf16 %v4171_v44, %v4170_v40 }
 0x1f2   : > { %v1195_v45 = vpop.f32.mrf.mxu1 }
 0x1f3   : > { %v5356_v46 = vpack.c.bf16 %v1195_v45, %v1192_v43 }
 0x1f4   : > { %v4174_v48 = vpop.f32.mrf.mxu1 }
 0x1f5   : > { %4216 = vmatprep.mubr.bf16.mxu0 %v5356_v46 }
 0x1f6   : > { %v1208_v50 = vpop.f32.mrf.mxu1 }
 0x1f7   : > { %4217 = vmatmul.mubr.bf16.gmra.mxu0 %v5358_v49 }
 0x1f8   : > { %v4175_v51 = vpop.f32.mrf.mxu1 }
 0x1f9   : > { %v5364_v55 = vpack.c.bf16 %v4175_v51, %v4174_v48 }
 0x1fa   : > { %v1211_v52 = vpop.f32.mrf.mxu1 }
 0x1fb   : > { %v5362_v53 = vpack.c.bf16 %v1211_v52, %v1208_v50 }
 0x1fc   : > { %v4178_v54 = vpop.f32.mrf.mxu1 }
 0x1fd   : > { %4220 = vmatprep.mubr.bf16.mxu0 %v5362_v53 }
 0x1fe   : > { %v1224_v56 = vpop.f32.mrf.mxu1 }
 0x1ff   : > { %4221 = vmatmul.mubr.bf16.gmra.mxu0 %v5364_v55 }
 0x200   : > { %v4179_v57 = vpop.f32.mrf.mxu1 }
 0x201   : > { %v5370_v60 = vpack.c.bf16 %v4179_v57, %v4178_v54 }
 0x202   : > { %v1227_v58 = vpop.f32.mrf.mxu1 }
 0x203   : > { %v5368_v59 = vpack.c.bf16 %v1227_v58, %v1224_v56 }
 0x205   : > { %4224 = vmatprep.mubr.bf16.mxu0 %v5368_v59 }
 0x207   : > { %4225 = vmatmul.mubr.bf16.gmra.mxu0 %v5370_v60 }
 0x208   : > { %4278 = vmatprep.mubr.msk.bf16.mxu0 %vm4867_vm13, %v4865_v47 }
 0x28f   : > { %v4198_v5 = vpop.f32.mrf.mxu0 }
 0x290   : > { %v1369_v11 = vadd.f32 %v4198_v5, %v5396_v6 }
 0x291   : > { %v1360_v7 = vpop.f32.mrf.mxu0 }
 0x292   : > { %v1361_v8 = vadd.f32 %v5396_v6, %v1360_v7 }
 0x293   : > { %v4199_v9 = vpop.f32.mrf.mxu0 }
 0x294   : > { %v1372_v10 = vadd.f32 %v4199_v9, %v5396_v6  ;;  %4585 = vtanh.f32 %v1361_v8 }
 0x295   : > { %v1363_v12 = vpop.f32.mrf.mxu0 }
 0x296   : > { %v1364_v13 = vadd.f32 %v5396_v6, %v1363_v12  ;;  %4587 = vtanh.f32 %v1372_v10 }
 0x297   : > { %v4202_v14 = vpop.f32.mrf.mxu0 }
 0x298   : > { %4589 = vtanh.f32 %v1364_v13  ;;  %v1385_v20 = vadd.f32 %v4202_v14, %v5396_v6 }
 0x299   : > { %4591 = vtanh.f32 %v1369_v11  ;;  %v1376_v15 = vpop.f32.mrf.mxu0 }
 0x29a   : > { %v1377_v17 = vadd.f32 %v5396_v6, %v1376_v15 }
 0x29b   : > { %v4203_v18 = vpop.f32.mrf.mxu0 }
 0x29c   : > { %v1388_v19 = vadd.f32 %v4203_v18, %v5396_v6  ;;  %4593 = vtanh.f32 %v1377_v17 }
 0x29d   : > { %v1379_v23 = vpop.f32.mrf.mxu0 }
 0x29e   : > { %v1380_v24 = vadd.f32 %v5396_v6, %v1379_v23  ;;  %4595 = vtanh.f32 %v1388_v19 }
 0x29f   : > { %v4206_v25 = vpop.f32.mrf.mxu0 }
 0x2a0   : > { %4597 = vtanh.f32 %v1380_v24  ;;  %v1401_v37 = vadd.f32 %v4206_v25, %v5396_v6 }
 0x2a1   : > { %4599 = vtanh.f32 %v1385_v20  ;;  %v1392_v26 = vpop.f32.mrf.mxu0  ;;  %v4586_v30 = vpop.eup %4585 }
 0x2a2   : > { %v1393_v29 = vadd.f32 %v5396_v6, %v1392_v26 }
 0x2a3   : > { %v4207_v31 = vpop.f32.mrf.mxu0  ;;  %v4588_v32 = vpop.eup %4587 }
 0x2a4   : > { %v1404_v34 = vadd.f32 %v4207_v31, %v5396_v6  ;;  %4601 = vtanh.f32 %v1393_v29 }
 0x2a5   : > { %v4590_v36 = vpop.eup %4589  ;;  %v1395_v38 = vpop.f32.mrf.mxu0 }
 0x2a6   : > { %v4592_v40 = vpop.eup %4591  ;;  %v1396_v43 = vadd.f32 %v5396_v6, %v1395_v38  ;;  %v1519_v44 = vpack.c.bf16 %v4590_v36, %v4586_v30  ;;  %4603 = vtanh.f32 %v1404_v34 }
 0x2a7   : > { %v4210_v45 = vpop.f32.mrf.mxu0  ;;  %v1520_v48 = vpack.c.bf16 %v4588_v32, %v4592_v40 }
 0x2a8   : > { %4605 = vtanh.f32 %v1396_v43  ;;  %4244 = vmatprep.mubr.bf16.mxu1 %v1519_v44  ;;  %v1417_v61 = vadd.f32 %v4210_v45, %v5396_v6 }
 0x2a9   : > { %4607 = vtanh.f32 %v1401_v37  ;;  %v1408_v50 = vpop.f32.mrf.mxu0  ;;  %4245 = vmatmul.mubr.bf16.vlgmr.msra.gmra.mxu1 %v1520_v48  ;;  %v4594_v52 = vpop.eup %4593 }
 0x2aa   : > { %v1409_v51 = vadd.f32 %v5396_v6, %v1408_v50  ;;  %4283 = vmatpush3.bf16.msra.mxu1 %v5328_v16 }
 0x2ab   : > { %v4211_v54 = vpop.f32.mrf.mxu0  ;;  %4294 = vmatprep.subr.bf16.mxu1 %v4865_v47  ;;  %v4596_v56 = vpop.eup %4595 }
 0x2ac   : > { %v1420_v57 = vadd.f32 %v4211_v54, %v5396_v6  ;;  %4609 = vtanh.f32 %v1409_v51 }
 0x2ad   : > { %v4598_v58 = vpop.eup %4597  ;;  %v1411_v62 = vpop.f32.mrf.mxu0 }
 0x2ae   : > { %v4600_v63 = vpop.eup %4599  ;;  %v1412_v0 = vadd.f32 %v5396_v6, %v1411_v62  ;;  %v1521_v1 = vpack.c.bf16 %v4598_v58, %v4594_v52  ;;  %4611 = vtanh.f32 %v1420_v57 }
 0x2af   : > { %v4214_v4 = vpop.f32.mrf.mxu0  ;;  %v1522_v5 = vpack.c.bf16 %v4596_v56, %v4600_v63 }
 0x2b0   : > { %4613 = vtanh.f32 %v1412_v0  ;;  %4248 = vmatprep.mubr.bf16.mxu1 %v1521_v1  ;;  %v1433_v13 = vadd.f32 %v4214_v4, %v5396_v6 }
 0x2b1   : > { %4615 = vtanh.f32 %v1417_v61  ;;  %v1424_v16 = vpop.f32.mrf.mxu0  ;;  %4249 = vmatmul.mubr.bf16.gmra.mxu1 %v1522_v5  ;;  %v4602_v8 = vpop.eup %4601 }
 0x2b2   : > { %v1425_v7 = vadd.f32 %v5396_v6, %v1424_v16 }
 0x2b3   : > { %v4215_v9 = vpop.f32.mrf.mxu0  ;;  %v4604_v10 = vpop.eup %4603 }
 0x2b4   : > { %v1436_v11 = vadd.f32 %v4215_v9, %v5396_v6  ;;  %4617 = vtanh.f32 %v1425_v7 }
 0x2b5   : > { %v4606_v12 = vpop.eup %4605  ;;  %v1427_v14 = vpop.f32.mrf.mxu0 }
 0x2b6   : > { %v4608_v15 = vpop.eup %4607  ;;  %v1428_v17 = vadd.f32 %v5396_v6, %v1427_v14  ;;  %v1523_v18 = vpack.c.bf16 %v4606_v12, %v4602_v8  ;;  %4619 = vtanh.f32 %v1436_v11 }
 0x2b7   : > { %v4218_v19 = vpop.f32.mrf.mxu0  ;;  %v1524_v20 = vpack.c.bf16 %v4604_v10, %v4608_v15 }
 0x2b8   : > { %4621 = vtanh.f32 %v1428_v17  ;;  %4252 = vmatprep.mubr.bf16.mxu1 %v1523_v18  ;;  %v1449_v32 = vadd.f32 %v4218_v19, %v5396_v6 }
 0x2b9   : > { %4623 = vtanh.f32 %v1433_v13  ;;  %v1440_v23 = vpop.f32.mrf.mxu0  ;;  %4253 = vmatmul.mubr.bf16.gmra.mxu1 %v1524_v20  ;;  %v4610_v25 = vpop.eup %4609 }
 0x2ba   : > { %v1441_v24 = vadd.f32 %v5396_v6, %v1440_v23 }
 0x2bb   : > { %v4219_v26 = vpop.f32.mrf.mxu0  ;;  %v4612_v29 = vpop.eup %4611 }
 0x2bc   : > { %v1452_v30 = vadd.f32 %v4219_v26, %v5396_v6  ;;  %4625 = vtanh.f32 %v1441_v24 }
 0x2bd   : > { %v4614_v31 = vpop.eup %4613  ;;  %v1443_v34 = vpop.f32.mrf.mxu0 }
 0x2be   : > { %v4616_v36 = vpop.eup %4615  ;;  %v1444_v37 = vadd.f32 %v5396_v6, %v1443_v34  ;;  %v1525_v38 = vpack.c.bf16 %v4614_v31, %v4610_v25  ;;  %4627 = vtanh.f32 %v1452_v30  ;;  %v5434_v34 = vld [vmem:[#allocation2] ss:$0 sm:$0xff] }
 0x2bf   : > { %v4222_v40 = vpop.f32.mrf.mxu0  ;;  %v1526_v43 = vpack.c.bf16 %v4612_v29, %v4616_v36 }
 0x2c0   : > { %4629 = vtanh.f32 %v1444_v37  ;;  %4256 = vmatprep.mubr.bf16.mxu1 %v1525_v38  ;;  %v1465_v56 = vadd.f32 %v4222_v40, %v5396_v6 }
 0x2c1   : > { %4631 = vtanh.f32 %v1449_v32  ;;  %v1456_v44 = vpop.f32.mrf.mxu0  ;;  %4257 = vmatmul.mubr.bf16.gmra.mxu1 %v1526_v43  ;;  %v4618_v48 = vpop.eup %4617  ;;  %v4866_v32 = vmov 0  }
 0x2c2   : > { %v1457_v45 = vadd.f32 %v5396_v6, %v1456_v44  ;;  %4535 = vset.pattern.permute.xlu1 %v4866_v32  ;;  %4536 = vset.pattern.permute.xlu0 %v4866_v32 }
 0x2c3   : > { %v4223_v50 = vpop.f32.mrf.mxu0  ;;  %v4620_v51 = vpop.eup %4619 }
 0x2c4   : > { %v1468_v52 = vadd.f32 %v4223_v50, %v5396_v6  ;;  %4633 = vtanh.f32 %v1457_v45 }
 0x2c5   : > { %v4622_v54 = vpop.eup %4621  ;;  %v1459_v57 = vpop.f32.mrf.mxu0 }
 0x2c6   : > { %v4624_v58 = vpop.eup %4623  ;;  %v1460_v61 = vadd.f32 %v5396_v6, %v1459_v57  ;;  %v1527_v62 = vpack.c.bf16 %v4622_v54, %v4618_v48  ;;  %4635 = vtanh.f32 %v1468_v52 }
 0x2c7   : > { %v4226_v63 = vpop.f32.mrf.mxu0  ;;  %v1528_v0 = vpack.c.bf16 %v4620_v51, %v4624_v58 }
 0x2c8   : > { %4637 = vtanh.f32 %v1460_v61  ;;  %4260 = vmatprep.mubr.bf16.mxu1 %v1527_v62  ;;  %v1481_v10 = vadd.f32 %v4226_v63, %v5396_v6 }
 0x2c9   : > { %4639 = vtanh.f32 %v1465_v56  ;;  %v1472_v1 = vpop.f32.mrf.mxu0  ;;  %4261 = vmatmul.mubr.bf16.gmra.mxu1 %v1528_v0  ;;  %v4626_v5 = vpop.eup %4625 }
 0x2ca   : > { %v1473_v4 = vadd.f32 %v5396_v6, %v1472_v1 }
 0x2cb   : > { %v4227_v16 = vpop.f32.mrf.mxu0  ;;  %v4628_v7 = vpop.eup %4627 }
 0x2cc   : > { %v1484_v8 = vadd.f32 %v4227_v16, %v5396_v6  ;;  %4641 = vtanh.f32 %v1473_v4 }
 0x2cd   : > { %v4630_v9 = vpop.eup %4629  ;;  %v1475_v11 = vpop.f32.mrf.mxu0 }
 0x2ce   : > { %v4632_v12 = vpop.eup %4631  ;;  %v1476_v13 = vadd.f32 %v5396_v6, %v1475_v11  ;;  %v1529_v14 = vpack.c.bf16 %v4630_v9, %v4626_v5  ;;  %4643 = vtanh.f32 %v1484_v8 }
 0x2cf   : > { %v1530_v15 = vpack.c.bf16 %v4628_v7, %v4632_v12 }
 0x2d0   : > { %4645 = vtanh.f32 %v1476_v13  ;;  %4264 = vmatprep.mubr.bf16.mxu1 %v1529_v14 }
 0x2d1   : > { %4647 = vtanh.f32 %v1481_v10  ;;  %4265 = vmatmul.mubr.bf16.gmra.mxu1 %v1530_v15  ;;  %v4634_v17 = vpop.eup %4633 }
 0x2d3   : > { %v4636_v18 = vpop.eup %4635 }
 0x2d5   : > { %v4638_v19 = vpop.eup %4637 }
 0x2d6   : > { %v4640_v20 = vpop.eup %4639  ;;  %v1531_v23 = vpack.c.bf16 %v4638_v19, %v4634_v17 }
 0x2d7   : > { %v1532_v24 = vpack.c.bf16 %v4636_v18, %v4640_v20 }
 0x2d8   : > { %4268 = vmatprep.mubr.bf16.mxu1 %v1531_v23 }
 0x2d9   : > { %4269 = vmatmul.mubr.bf16.gmra.mxu1 %v1532_v24  ;;  %v4642_v25 = vpop.eup %4641 }
 0x2db   : > { %v4644_v26 = vpop.eup %4643 }
 0x2dd   : > { %v4646_v29 = vpop.eup %4645 }
 0x2de   : > { %v4648_v30 = vpop.eup %4647  ;;  %v1533_v6 = vpack.c.bf16 %v4646_v29, %v4642_v25 }
 0x2df   : > { %v1534_v31 = vpack.c.bf16 %v4644_v26, %v4648_v30 }
 0x2e0   : > { %4272 = vmatprep.mubr.bf16.mxu1 %v1533_v6 }
 0x2e1   : > { %4273 = vmatmul.mubr.bf16.gmra.mxu1 %v1534_v31 }
 0x2e2   : > { %4284 = vmatprep.mubr.msk.bf16.mxu1 %vm4867_vm13, %v4865_v47 }
 0x369   : > { %v4246_v36 = vpop.f32.mrf.mxu1 }
 0x36a   : > { %v1649_v37 = vadd.f32 %v4246_v36, %v5434_v34 }
 0x36b   : > { %v1640_v38 = vpop.f32.mrf.mxu1 }
 0x36c   : > { %v1641_v40 = vadd.f32 %v5434_v34, %v1640_v38  ;;  %1810 = vperm.xlu1 %4535, %v1649_v37  }
 0x36d   : > { %v4247_v43 = vpop.f32.mrf.mxu1 }
 0x36e   : > { %1804 = vperm.xlu0 %4536, %v1641_v40   ;;  %v1652_v45 = vadd.f32 %v4247_v43, %v5434_v34 }
 0x36f   : > { %v1643_v44 = vpop.f32.mrf.mxu1 }
 0x370   : > { %v1644_v48 = vadd.f32 %v5434_v34, %v1643_v44 }
 0x371   : > { %v4250_v50 = vpop.f32.mrf.mxu1 }
 0x372   : > { %1807 = vperm.xlu1 %4535, %v1644_v48   ;;  %1813 = vperm.xlu0 %4536, %v1652_v45   ;;  %v1665_v52 = vadd.f32 %v4250_v50, %v5434_v34 }
 0x373   : > { %v1656_v51 = vpop.f32.mrf.mxu1 }
 0x374   : > { %v1657_v58 = vadd.f32 %v5434_v34, %v1656_v51 }
 0x375   : > { %v4251_v54 = vpop.f32.mrf.mxu1 }
 0x376   : > { %v1668_v56 = vadd.f32 %v4251_v54, %v5434_v34  ;;  %1822 = vperm.xlu1 %4535, %v1665_v52  }
 0x377   : > { %v1659_v57 = vpop.f32.mrf.mxu1 }
 0x378   : > { %1825 = vperm.xlu0 %4536, %v1668_v56   ;;  %v1660_v62 = vadd.f32 %v5434_v34, %v1659_v57 }
 0x379   : > { %v4254_v61 = vpop.f32.mrf.mxu1 }
 0x37a   : > { %1816 = vperm.xlu1 %4535, %v1657_v58   ;;  %v1681_v0 = vadd.f32 %v4254_v61, %v5434_v34 }
 0x37b   : > { %v1672_v63 = vpop.f32.mrf.mxu1 }
 0x37c   : > { %1819 = vperm.xlu0 %4536, %v1660_v62   ;;  %v1673_v16 = vadd.f32 %v5434_v34, %v1672_v63 }
 0x37d   : > { %v4255_v1 = vpop.f32.mrf.mxu1 }
 0x37e   : > { %v1684_v4 = vadd.f32 %v4255_v1, %v5434_v34  ;;  %1834 = vperm.xlu1 %4535, %v1681_v0  }
 0x37f   : > { %v1675_v5 = vpop.f32.mrf.mxu1 }
 0x380   : > { %1837 = vperm.xlu0 %4536, %v1684_v4   ;;  %v1676_v8 = vadd.f32 %v5434_v34, %v1675_v5 }
 0x381   : > { %v4258_v7 = vpop.f32.mrf.mxu1 }
 0x382   : > { %1828 = vperm.xlu1 %4535, %v1673_v16   ;;  %v1697_v10 = vadd.f32 %v4258_v7, %v5434_v34 }
 0x383   : > { %v1688_v9 = vpop.f32.mrf.mxu1 }
 0x384   : > { %1831 = vperm.xlu0 %4536, %v1676_v8   ;;  %v1689_v14 = vadd.f32 %v5434_v34, %v1688_v9  ;;  %v1903_v9 = vadd.s32 4294967288, %v5218_v42 }
 0x385   : > { %v4259_v11 = vpop.f32.mrf.mxu1 }
 0x386   : > { %v1700_v12 = vadd.f32 %v4259_v11, %v5434_v34  ;;  %1846 = vperm.xlu1 %4535, %v1697_v10  }
 0x387   : > { %v1691_v13 = vpop.f32.mrf.mxu1 }
 0x388   : > { %1849 = vperm.xlu0 %4536, %v1700_v12   ;;  %v1692_v17 = vadd.f32 %v5434_v34, %v1691_v13  ;;  %v5470_v12 = vsub.s32 %v1903_v9, %v5170_v2 }
 0x389   : > { %v4262_v15 = vpop.f32.mrf.mxu1 }
 0x38a   : > { %1840 = vperm.xlu1 %4535, %v1689_v14   ;;  %v1713_v19 = vadd.f32 %v4262_v15, %v5434_v34  ;;  %v5474_v14 = vsub.s32 %v5218_v42, %v5170_v2 }
 0x38b   : > { %v1704_v18 = vpop.f32.mrf.mxu1 }
 0x38c   : > { %1843 = vperm.xlu0 %4536, %v1692_v17   ;;  %v1705_v25 = vadd.f32 %v5434_v34, %v1704_v18 }
 0x38d   : > { %v4263_v20 = vpop.f32.mrf.mxu1 }
 0x38e   : > { %v1716_v23 = vadd.f32 %v4263_v20, %v5434_v34  ;;  %1858 = vperm.xlu1 %4535, %v1713_v19  }
 0x38f   : > { %v1707_v24 = vpop.f32.mrf.mxu1 }
 0x390   : > { %1861 = vperm.xlu0 %4536, %v1716_v23   ;;  %v1708_v29 = vadd.f32 %v5434_v34, %v1707_v24 }
 0x391   : > { %v4266_v26 = vpop.f32.mrf.mxu1 }
 0x392   : > { %1852 = vperm.xlu1 %4535, %v1705_v25   ;;  %v1729_v6 = vadd.f32 %v4266_v26, %v5434_v34 }
 0x393   : > { %v1720_v30 = vpop.f32.mrf.mxu1 }
 0x394   : > { %1855 = vperm.xlu0 %4536, %v1708_v29   ;;  %v1721_v38 = vadd.f32 %v5434_v34, %v1720_v30 }
 0x395   : > { %v4267_v31 = vpop.f32.mrf.mxu1 }
 0x396   : > { %v1732_v36 = vadd.f32 %v4267_v31, %v5434_v34  ;;  %1870 = vperm.xlu1 %4535, %v1729_v6  }
 0x397   : > { %v1723_v37 = vpop.f32.mrf.mxu1 }
 0x398   : > { %1873 = vperm.xlu0 %4536, %v1732_v36   ;;  %v1724_v43 = vadd.f32 %v5434_v34, %v1723_v37 }
 0x399   : > { %v4270_v40 = vpop.f32.mrf.mxu1 }
 0x39a   : > { %1864 = vperm.xlu1 %4535, %v1721_v38   ;;  %v1745_v45 = vadd.f32 %v4270_v40, %v5434_v34 }
 0x39b   : > { %v1736_v44 = vpop.f32.mrf.mxu1 }
 0x39c   : > { %1867 = vperm.xlu0 %4536, %v1724_v43   ;;  %v1737_v52 = vadd.f32 %v5434_v34, %v1736_v44 }
 0x39d   : > { %v4271_v48 = vpop.f32.mrf.mxu1 }
 0x39e   : > { %v1748_v50 = vadd.f32 %v4271_v48, %v5434_v34  ;;  %1882 = vperm.xlu1 %4535, %v1745_v45  }
 0x39f   : > { %v1739_v51 = vpop.f32.mrf.mxu1 }
 0x3a0   : > { %1885 = vperm.xlu0 %4536, %v1748_v50   ;;  %v1740_v56 = vadd.f32 %v5434_v34, %v1739_v51 }
 0x3a1   : > { %v4274_v54 = vpop.f32.mrf.mxu1 }
 0x3a2   : > { %1876 = vperm.xlu1 %4535, %v1737_v52   ;;  %v1761_v63 = vadd.f32 %v4274_v54, %v5434_v34 }
 0x3a3   : > { %v1752_v57 = vpop.f32.mrf.mxu1 }
 0x3a4   : > { %v1753_v58 = vadd.f32 %v5434_v34, %v1752_v57  ;;  %1879 = vperm.xlu0 %4536, %v1740_v56  }
 0x3a5   : > { %v4275_v61 = vpop.f32.mrf.mxu1 }
 0x3a6   : > { %1888 = vperm.xlu1 %4535, %v1753_v58   ;;  %v1764_v1 = vadd.f32 %v4275_v61, %v5434_v34  ;;  %v5499_v61 = vld [vmem:[%s5154_s20] sm:$0xff] }
 0x3a7   : > { %v1755_v62 = vpop.f32.mrf.mxu1  ;;  %vm1769_vm10 = vcmp.gt.f32.partialorder %v5499_v61, 0.0 }
 0x3a8   : > { %v1756_v0 = vadd.f32 %v5434_v34, %v1755_v62 }
 0x3aa   : > { %1891 = vperm.xlu0 %4536, %v1756_v0   ;;  %1894 = vperm.xlu1 %4535, %v1761_v63  }
 0x3ae   : > { %1897 = vperm.xlu0 %4536, %v1764_v1  }
 0x3e7   : > { %v1811_v4 = vpop.permute.xlu1 %1810 }
 0x3e8   : > { %v1913_v20 = vrot.slane %v1811_v4, %v5474_v14 }
 0x3e9   : > { %v1805_v5 = vpop.permute.xlu0 %1804 }
 0x3ea   : > { %v1902_v23 = vrot.slane %v1805_v5, %v5474_v14 }
 0x3ed   : > { %v1808_v16 = vpop.permute.xlu1 %1807  ;;  %v1814_v7 = vpop.permute.xlu0 %1813 }
 0x3ee   : > { %v1907_v34 = vrot.slane %v1808_v16, %v5470_v12  ;;  %v1917_v17 = vrot.slane %v1814_v7, %v5470_v12 }
 0x3f0   : > { %v1909_v26 = vsel %vm1908_vm4, %v1907_v34, %v1902_v23  ;;  %v1918_v42 = vsel %vm1908_vm4, %v1917_v17, %v1913_v20 }
 0x3f1   : > { %v1823_v8 = vpop.permute.xlu1 %1822  ;;  %v2046_v37 = vsel %vm2045_vm2, %v1918_v42, %v1909_v26 }
 0x3f2   : > { %v1931_v40 = vrot.slane %v1823_v8, %v5474_v14 }
 0x3f3   : > { %v1826_v10 = vpop.permute.xlu0 %1825 }
 0x3f4   : > { %v1935_v31 = vrot.slane %v1826_v10, %v5470_v12 }
 0x3f5   : > { %v1817_v11 = vpop.permute.xlu1 %1816 }
 0x3f6   : > { %v1922_v25 = vrot.slane %v1817_v11, %v5474_v14  ;;  %v1936_v48 = vsel %vm1908_vm4, %v1935_v31, %v1931_v40 }
 0x3f7   : > { %v1820_v13 = vpop.permute.xlu0 %1819 }
 0x3f8   : > { %v1926_v19 = vrot.slane %v1820_v13, %v5470_v12 }
 0x3f9   : > { %v1835_v15 = vpop.permute.xlu1 %1834 }
 0x3fa   : > { %v1927_v30 = vsel %vm1908_vm4, %v1926_v19, %v1922_v25  ;;  %v1949_v54 = vrot.slane %v1835_v15, %v5474_v14 }
 0x3fb   : > { %v1838_v18 = vpop.permute.xlu0 %1837  ;;  %v2048_v43 = vsel %vm2047_vm3, %v1927_v30, %v2046_v37 }
 0x3fc   : > { %v1953_v50 = vrot.slane %v1838_v18, %v5470_v12  ;;  %v2050_v52 = vsel %vm2049_vm5, %v1936_v48, %v2048_v43 }
 0x3fd   : > { %v1829_v24 = vpop.permute.xlu1 %1828 }
 0x3fe   : > { %v1940_v38 = vrot.slane %v1829_v24, %v5474_v14  ;;  %v1954_v0 = vsel %vm1908_vm4, %v1953_v50, %v1949_v54 }
 0x3ff   : > { %v1832_v29 = vpop.permute.xlu0 %1831 }
 0x400   : > { %v1944_v6 = vrot.slane %v1832_v29, %v5470_v12 }
 0x401   : > { %v1847_v36 = vpop.permute.xlu1 %1846 }
 0x402   : > { %v1945_v45 = vsel %vm1908_vm4, %v1944_v6, %v1940_v38  ;;  %v1967_v1 = vrot.slane %v1847_v36, %v5474_v14 }
 0x403   : > { %v1850_v44 = vpop.permute.xlu0 %1849  ;;  %v2052_v56 = vsel %vm2051_vm6, %v1945_v45, %v2050_v52 }
 0x404   : > { %v1971_v57 = vrot.slane %v1850_v44, %v5470_v12  ;;  %v2054_v16 = vsel %vm2053_vm7, %v1954_v0, %v2052_v56 }
 0x405   : > { %v1841_v51 = vpop.permute.xlu1 %1840 }
 0x406   : > { %v1958_v62 = vrot.slane %v1841_v51, %v5474_v14  ;;  %v1972_v8 = vsel %vm1908_vm4, %v1971_v57, %v1967_v1 }
 0x407   : > { %v1844_v58 = vpop.permute.xlu0 %1843 }
 0x408   : > { %v1962_v63 = vrot.slane %v1844_v58, %v5470_v12 }
 0x409   : > { %v1859_v4 = vpop.permute.xlu1 %1858 }
 0x40a   : > { %v1963_v5 = vsel %vm1908_vm4, %v1962_v63, %v1958_v62  ;;  %v1985_v36 = vrot.slane %v1859_v4, %v5474_v14 }
 0x40b   : > { %v1862_v7 = vpop.permute.xlu0 %1861  ;;  %v2056_v9 = vsel %vm2055_vm8, %v1963_v5, %v2054_v16  ;;  %v5538_v16 = vld [vmem:[%s5154_s20 + $0x8] sm:$0xff]  ;;  %s3861_s20 = sshll.u32 %s5143_s26, 1 }
 0x40c   : > { %v2058_v10 = vsel %vm2057_vm9, %v1972_v8, %v2056_v9  ;;  %v1989_v29 = vrot.slane %v1862_v7, %v5470_v12  ;;  %vm1770_vm12 = vcmp.gt.f32.partialorder %v5538_v16, 0.0  ;;  %s5813_s25 = scalar_lea.vmem [#allocation11], %s3861_s20 }
 0x40d   : > { %v1853_v11 = vpop.permute.xlu1 %1852  ;;  %v2068_v13 = vsel %vm1769_vm10, %v2058_v10, -1e+30  ;;  %s3673_s20 = sshll.u32 %s5813_s25, 4  ;;  %s5847_s20 = int_to_ptr.vmem [resolvable:$true] %s3673_s20 }
 0x40e   : > { %v2071_v15 = vsel %vm2070_vm11, %v2068_v13, -inf  ;;  %v1976_v30 = vrot.slane %v1853_v11, %v5474_v14  ;;  %v1990_v44 = vsel %vm1908_vm4, %v1989_v29, %v1985_v36  ;;  %p4786_p1 = scmp.lt.s32.totalorder %s5847_s20, %s4784_s23 }
 0x40f   : > { %v1856_v34 = vpop.permute.xlu0 %1855  ;;  %2072 = vmax.xlane.f32.xlu1 %v2071_v15 }
 0x410   : > { %v1980_v25 = vrot.slane %v1856_v34, %v5470_v12 }
 0x411   : > { %v1871_v17 = vpop.permute.xlu1 %1870 }
 0x412   : > { %v1981_v37 = vsel %vm1908_vm4, %v1980_v25, %v1976_v30  ;;  %v2003_v51 = vrot.slane %v1871_v17, %v5474_v14 }
 0x413   : > { %v1874_v18 = vpop.permute.xlu0 %1873  ;;  %v2059_v48 = vsel %vm2045_vm2, %v1990_v44, %v1981_v37 }
 0x414   : > { %v2007_v45 = vrot.slane %v1874_v18, %v5470_v12 }
 0x415   : > { %v1865_v19 = vpop.permute.xlu1 %1864 }
 0x416   : > { %v1994_v6 = vrot.slane %v1865_v19, %v5474_v14  ;;  %v2008_v57 = vsel %vm1908_vm4, %v2007_v45, %v2003_v51 }
 0x417   : > { %v1868_v20 = vpop.permute.xlu0 %1867 }
 0x418   : > { %v1998_v26 = vrot.slane %v1868_v20, %v5470_v12 }
 0x419   : > { %v1883_v23 = vpop.permute.xlu1 %1882 }
 0x41a   : > { %v1999_v38 = vsel %vm1908_vm4, %v1998_v26, %v1994_v6  ;;  %v2021_v4 = vrot.slane %v1883_v23, %v5474_v14 }
 0x41b   : > { %v1886_v24 = vpop.permute.xlu0 %1885  ;;  %v2060_v52 = vsel %vm2047_vm3, %v1999_v38, %v2059_v48 }
 0x41c   : > { %v2025_v58 = vrot.slane %v1886_v24, %v5470_v12  ;;  %v2061_v63 = vsel %vm2049_vm5, %v2008_v57, %v2060_v52 }
 0x41d   : > { %v1877_v42 = vpop.permute.xlu1 %1876 }
 0x41e   : > { %v2012_v50 = vrot.slane %v1877_v42, %v5474_v14  ;;  %v2026_v9 = vsel %vm1908_vm4, %v2025_v58, %v2021_v4 }
 0x41f   : > { %v1880_v31 = vpop.permute.xlu0 %1879 }
 0x420   : > { %v2016_v40 = vrot.slane %v1880_v31, %v5470_v12 }
 0x421   : > { %v1889_v43 = vpop.permute.xlu1 %1888 }
 0x422   : > { %v2017_v54 = vsel %vm1908_vm4, %v2016_v40, %v2012_v50  ;;  %v2030_v0 = vrot.slane %v1889_v43, %v5474_v14  ;;  %v4868_v43 = vmov 1966171168  }
 0x423   : > { %v2062_v5 = vsel %vm2051_vm6, %v2017_v54, %v2061_v63  ;;  %v2103_v44 = vunpack.c.l.s4 %v4868_v43 }
 0x424   : > { %v2063_v15 = vsel %vm2053_vm7, %v2026_v9, %v2062_v5 }
 0x425   : > { %v1892_v56 = vpop.permute.xlu0 %1891  ;;  %v1895_v1 = vpop.permute.xlu1 %1894  ;;  %v2104_v45 = vunpack.c.0.s8 %v2103_v44 }
 0x426   : > { %v2034_v62 = vrot.slane %v1892_v56, %v5470_v12  ;;  %v2039_v10 = vrot.slane %v1895_v1, %v5474_v14 }
 0x427   : > { %v5563_v52 = vsub.s32 %v2104_v45, %v5170_v2 }
 0x428   : > { %v2035_v7 = vsel %vm1908_vm4, %v2034_v62, %v2030_v0 }
 0x429   : > { %v1898_v8 = vpop.permute.xlu0 %1897  ;;  %v2064_v17 = vsel %vm2055_vm8, %v2035_v7, %v2063_v15 }
 0x42a   : > { %v2043_v11 = vrot.slane %v1898_v8, %v5470_v12 }
 0x42c   : > { %v2044_v34 = vsel %vm1908_vm4, %v2043_v11, %v2039_v10 }
 0x42d   : > { %v2065_v18 = vsel %vm2057_vm9, %v2044_v34, %v2064_v17 }
 0x42e   : > { %v2069_v19 = vsel %vm1770_vm12, %v2065_v18, -1e+30 }
 0x42f   : > { %v2074_v20 = vsel %vm2070_vm11, %v2069_v19, -inf }
 0x430   : > { %2075 = vmax.xlane.f32.xlu0 %v2074_v20 }
 0x498   : > { %v2073_v23 = vpop.xlane.xlu1 %2072 }
 0x499   : > { %v2077_v14 = vsub.f32 %v2068_v13, %v2073_v23 }
 0x49b   : > { %v2079_v24 = vmul.f32 1.442695, %v2077_v14 }
 0x49d   : > { %4649 = vpow2.f32 %v2079_v24 }
 0x4aa   : > { %v4650_v12 = vpop.eup %4649 }
 0x4ab   : > { %v2083_v25 = vsel %vm1769_vm10, %v4650_v12, 0.0 }
 0x4ac   : > { %v2085_v26 = vsel %vm2070_vm11, %v2083_v25, 0.0 }
 0x4ad   : > { %2086 = vadd.xlane.f32.xlu0 %v2085_v26 }
 0x4b9   : > { %v2076_v42 = vpop.xlane.xlu0 %2075 }
 0x4ba   : > { %v2078_v29 = vsub.f32 %v2069_v19, %v2076_v42 }
 0x4bc   : > { %v2081_v30 = vmul.f32 1.442695, %v2078_v29 }
 0x4be   : > { %4651 = vpow2.f32 %v2081_v30 }
 0x4cb   : > { %v4652_v6 = vpop.eup %4651 }
 0x4cc   : > { %v2084_v31 = vsel %vm1770_vm12, %v4652_v6, 0.0 }
 0x4cd   : > { %v2088_v36 = vsel %vm2070_vm11, %v2084_v31, 0.0 }
 0x4ce   : > { %2089 = vadd.xlane.f32.xlu1 %v2088_v36 }
 0x536   : > { %v2087_v13 = vpop.xlane.xlu0 %2086 }
 0x537   : > { %vm2091_vm14 = vcmp.eq.f32.partialorder %v2087_v13, 0.0 }
 0x538   : > { %v2093_v37 = vsel %vm2091_vm14, 1.0, %v2087_v13 }
 0x539   : > { %4653 = vrcp.f32 %v2093_v37 }
 0x546   : > { %v4654_v48 = vpop.eup %4653 }
 0x547   : > { %v2097_v51 = vmul.f32 %v4654_v48, %v2083_v25 }
 0x557   : > { %v2090_v38 = vpop.xlane.xlu1 %2089 }
 0x558   : > { %vm2092_vm15 = vcmp.eq.f32.partialorder %v2090_v38, 0.0 }
 0x559   : > { %v2094_v40 = vsel %vm2092_vm15, 1.0, %v2090_v38 }
 0x55a   : > { %4655 = vrcp.f32 %v2094_v40 }
 0x567   : > { %v4656_v50 = vpop.eup %4655 }
 0x568   : > { %v2098_v54 = vmul.f32 %v4656_v50, %v2084_v31  ;;  %v4554_v50 = vld [vmem:[#allocation8 + $0x30] sm:$0xff]  }
 0x56a   : > { %v2099_v56 = vpack.c.bf16 %v2098_v54, %v2097_v51  ;;  %v3934_v34 = vpack.c.bf16 %v2098_v54, %v2098_v54  ;;  %v4555_v51 = vld [vmem:[#allocation8 + $0x28] sm:$0xff]   ;;  %v4557_v54 = vld [vmem:[#allocation8 + $0x18] sm:$0xff]  }
 0x56c   : > { %v2108_v57 = vrot.slane %v2099_v56, %v5563_v52  ;;  %v2115_v19 = vrot.slane %v3934_v34, %v5563_v52  ;;  %v4558_v56 = vld [vmem:[#allocation8 + $0x10] sm:$0xff]  }
 0x56e   : > { %v2124_v58 = vrot.slane %v2108_v57, %v5563_v52  ;;  %v2116_v62 = vcombine.high %v2108_v57, %v2108_v57  ;;  %v2131_v24 = vrot.slane %v2115_v19, %v5563_v52  ;;  %v2117_v26 = vcombine.high %v2115_v19, %v2115_v19  ;;  %v4559_v57 = vld [vmem:[#allocation8 + $0x8] sm:$0xff]  }
 0x570   : > { %v3935_v63 = vpack.i.b16 %v2124_v58, %v2124_v58  ;;  %v2151_v0 = vunpack.i.h.s16 %v2124_v58  ;;  %v2138_v1 = vrot.slane %v2116_v62, %v5563_v52  ;;  %v2146_v10 = vcombine.high %v2124_v58, %v2124_v58  ;;  %v4560_v58 = vld [vmem:[#allocation8] sm:$0xff]   ;;  %v4561_v62 = vld [vmem:[%s5910_s9 + $0x38] sm:$0xff]  }
 0x571   : > { %v2159_v25 = vunpack.i.h.s16 %v2131_v24  ;;  %v2145_v29 = vrot.slane %v2117_v26, %v5563_v52  ;;  %v2147_v36 = vcombine.high %v2131_v24, %v2131_v24 }
 0x572   : > { %v2170_v4 = vrot.slane %v3935_v63, %v5175_v3  ;;  %v2214_v5 = vpack.i.b16 %v2151_v0, %v2151_v0  ;;  %v2153_v2 = vunpack.i.h.s16 %v2138_v1  ;;  %v3938_v8 = vpack.i.b16 %v2138_v1, %v2138_v1  ;;  %v4562_v63 = vld [vmem:[%s5910_s9 + $0x30] sm:$0xff]  }
 0x573   : > { %v2155_v15 = vunpack.i.h.s16 %v2146_v10  ;;  %v2148_v18 = vcombine.high %v2138_v1, %v2138_v1  ;;  %v2598_v42 = vpack.i.b16 %v2159_v25, %v2159_v25  ;;  %v2161_v6 = vunpack.i.h.s16 %v2145_v29 }
 0x574   : > { %4279 = vmatmul.mubr.msk.bf16.vlgmr.msra.gmra.mxu0 %vm2070_vm11, %v2170_v4  ;;  %v2218_v7 = vrot.slane %v2214_v5, %v5175_v3  ;;  %v2310_v9 = vpack.i.b16 %v2153_v2, %v2153_v2  ;;  %v2266_v11 = vrot.slane %v3938_v8, %v5175_v3  ;;  %v2163_v37 = vunpack.i.h.s16 %v2147_v36 }
 0x575   : > { %4289 = vmatpush3.bf16.msra.mxu0 %v5332_v21  ;;  %4290 = vmatprep.mubr.msk.bf16.mxu0 %vm4867_vm13, %v4865_v47  ;;  %v2406_v17 = vpack.i.b16 %v2155_v15, %v2155_v15  ;;  %v2157_v23 = vunpack.i.h.s16 %v2148_v18  ;;  %v2602_v30 = vrot.slane %v2598_v42, %v5175_v3  ;;  %v2694_v31 = vpack.i.b16 %v2161_v6, %v2161_v6 }
 0x576   : > { %4285 = vmatmul.mubr.msk.bf16.vlgmr.msra.gmra.mxu1 %vm2070_vm11, %v2218_v7  ;;  %4300 = vmatprep.subr.bf16.mxu0 %v4865_v47  ;;  %v2314_v21 = vrot.slane %v2310_v9, %v5175_v3  ;;  %v2790_v38 = vpack.i.b16 %v2163_v37, %v2163_v37  ;;  %v2149_v40 = vcombine.high %v2145_v29, %v2145_v29 }
 0x577   : > { %4295 = vmatpush3.bf16.msra.mxu1 %v5334_v22  ;;  %4296 = vmatprep.mubr.msk.bf16.mxu1 %vm4867_vm13, %v4865_v47  ;;  %v3941_v22 = vpack.i.b16 %v2146_v10, %v2146_v10  ;;  %v2410_v20 = vrot.slane %v2406_v17, %v5175_v3  ;;  %v2502_v14 = vpack.i.b16 %v2157_v23, %v2157_v23 }
 0x578   : > { %4306 = vmatprep.subr.bf16.mxu1 %v4865_v47  ;;  %v2165_v44 = vunpack.i.h.s16 %v2149_v40 }
 0x579   : > { %v2506_v12 = vrot.slane %v2502_v14, %v5175_v3 }
 0x57a   : > { %v2886_v45 = vpack.i.b16 %v2165_v44, %v2165_v44 }
 0x57c   : > { %4291 = vmatmul.mubr.msk.bf16.vlgmr.msra.gmra.mxu0 %vm2070_vm11, %v2266_v11 }
 0x57d   : > { %4301 = vmatpush3.bf16.msra.mxu0 %v5338_v27  ;;  %4302 = vmatprep.mubr.msk.bf16.mxu0 %vm4867_vm13, %v4865_v47  ;;  %v2362_v27 = vrot.slane %v3941_v22, %v5175_v3 }
 0x57e   : > { %4297 = vmatmul.mubr.msk.bf16.vlgmr.msra.gmra.mxu1 %vm2070_vm11, %v2314_v21  ;;  %4312 = vmatprep.subr.bf16.mxu0 %v4865_v47 }
 0x57f   : > { %4307 = vmatpush3.bf16.msra.mxu1 %v5340_v28  ;;  %4308 = vmatprep.mubr.msk.bf16.mxu1 %vm4867_vm13, %v4865_v47  ;;  %v3944_v28 = vpack.i.b16 %v2148_v18, %v2148_v18 }
 0x580   : > { %4318 = vmatprep.subr.bf16.mxu1 %v4865_v47 }
 0x584   : > { %4303 = vmatmul.mubr.msk.bf16.vlgmr.msra.gmra.mxu0 %vm2070_vm11, %v2362_v27 }
 0x585   : > { %4313 = vmatpush3.bf16.msra.mxu0 %v5344_v33  ;;  %4314 = vmatprep.mubr.msk.bf16.mxu0 %vm4867_vm13, %v4865_v47  ;;  %v2458_v33 = vrot.slane %v3944_v28, %v5175_v3 }
 0x586   : > { %4309 = vmatmul.mubr.msk.bf16.vlgmr.msra.gmra.mxu1 %vm2070_vm11, %v2410_v20  ;;  %4324 = vmatprep.subr.bf16.mxu0 %v4865_v47 }
 0x587   : > { %4319 = vmatpush3.bf16.msra.mxu1 %v5346_v35  ;;  %4320 = vmatprep.mubr.msk.bf16.mxu1 %vm4867_vm13, %v4865_v47  ;;  %v3947_v35 = vpack.i.b16 %v2131_v24, %v2131_v24 }
 0x588   : > { %4330 = vmatprep.subr.bf16.mxu1 %v4865_v47 }
 0x58c   : > { %4315 = vmatmul.mubr.msk.bf16.vlgmr.msra.gmra.mxu0 %vm2070_vm11, %v2458_v33 }
 0x58d   : > { %4325 = vmatpush3.bf16.msra.mxu0 %v5350_v39  ;;  %4326 = vmatprep.mubr.msk.bf16.mxu0 %vm4867_vm13, %v4865_v47  ;;  %v2554_v39 = vrot.slane %v3947_v35, %v5175_v3 }
 0x58e   : > { %4321 = vmatmul.mubr.msk.bf16.vlgmr.msra.gmra.mxu1 %vm2070_vm11, %v2506_v12  ;;  %4336 = vmatprep.subr.bf16.mxu0 %v4865_v47 }
 0x58f   : > { %4331 = vmatpush3.bf16.msra.mxu1 %v5352_v41  ;;  %4332 = vmatprep.mubr.msk.bf16.mxu1 %vm4867_vm13, %v4865_v47  ;;  %v3950_v41 = vpack.i.b16 %v2145_v29, %v2145_v29 }
 0x590   : > { %4342 = vmatprep.subr.bf16.mxu1 %v4865_v47 }
 0x591   : > { %v2650_v13 = vrot.slane %v3950_v41, %v5175_v3 }
 0x594   : > { %4327 = vmatmul.mubr.msk.bf16.vlgmr.msra.gmra.mxu0 %vm2070_vm11, %v2554_v39 }
 0x595   : > { %4337 = vmatpush3.bf16.msra.mxu0 %v5356_v46  ;;  %4338 = vmatprep.mubr.msk.bf16.mxu0 %vm4867_vm13, %v4865_v47  ;;  %v2698_v46 = vrot.slane %v2694_v31, %v5175_v3 }
 0x596   : > { %4333 = vmatmul.mubr.msk.bf16.vlgmr.msra.gmra.mxu1 %vm2070_vm11, %v2602_v30  ;;  %4348 = vmatprep.subr.bf16.mxu0 %v4865_v47 }
 0x597   : > { %4343 = vmatpush3.bf16.msra.mxu1 %v5358_v49  ;;  %4344 = vmatprep.mubr.msk.bf16.mxu1 %vm4867_vm13, %v4865_v47  ;;  %v3953_v49 = vpack.i.b16 %v2147_v36, %v2147_v36 }
 0x598   : > { %4354 = vmatprep.subr.bf16.mxu1 %v4865_v47 }
 0x599   : > { %v2746_v43 = vrot.slane %v3953_v49, %v5175_v3 }
 0x59c   : > { %4339 = vmatmul.mubr.msk.bf16.vlgmr.msra.gmra.mxu0 %vm2070_vm11, %v2650_v13 }
 0x59d   : > { %4349 = vmatpush3.bf16.msra.mxu0 %v5362_v53  ;;  %4350 = vmatprep.mubr.msk.bf16.mxu0 %vm4867_vm13, %v4865_v47  ;;  %v2794_v53 = vrot.slane %v2790_v38, %v5175_v3 }
 0x59e   : > { %4345 = vmatmul.mubr.msk.bf16.vlgmr.msra.gmra.mxu1 %vm2070_vm11, %v2698_v46  ;;  %4360 = vmatprep.subr.bf16.mxu0 %v4865_v47 }
 0x59f   : > { %4355 = vmatpush3.bf16.msra.mxu1 %v5364_v55  ;;  %4356 = vmatprep.mubr.msk.bf16.mxu1 %vm4867_vm13, %v4865_v47  ;;  %v3956_v55 = vpack.i.b16 %v2149_v40, %v2149_v40 }
 0x5a0   : > { %4366 = vmatprep.subr.bf16.mxu1 %v4865_v47 }
 0x5a1   : > { %v2842_v48 = vrot.slane %v3956_v55, %v5175_v3 }
 0x5a4   : > { %4351 = vmatmul.mubr.msk.bf16.vlgmr.msra.gmra.mxu0 %vm2070_vm11, %v2746_v43 }
 0x5a5   : > { %4361 = vmatpush3.bf16.msra.mxu0 %v5368_v59  ;;  %4362 = vmatprep.mubr.msk.bf16.mxu0 %vm4867_vm13, %v4865_v47  ;;  %v2890_v59 = vrot.slane %v2886_v45, %v5175_v3  ;;  %v4556_v3 = vld [vmem:[#allocation8 + $0x20] sm:$0xff]  }
 0x5a6   : > { %4357 = vmatmul.mubr.msk.bf16.vlgmr.msra.gmra.mxu1 %vm2070_vm11, %v2794_v53  ;;  %4372 = vmatprep.subr.bf16.mxu0 %v4865_v47 }
 0x5a7   : > { %4367 = vmatpush3.bf16.msra.mxu1 %v5370_v60  ;;  %4368 = vmatprep.mubr.msk.bf16.mxu1 %vm4867_vm13, %v4865_v47  ;;  %v4553_v60 = vld [vmem:[#allocation8 + $0x38] sm:$0xff]  }
 0x5a8   : > { %4392 = vmatprep.subr.bf16.mxu1 %v4865_v47 }
 0x5ac   : > { %4363 = vmatmul.mubr.msk.bf16.vlgmr.msra.gmra.mxu0 %vm2070_vm11, %v2842_v48 }
 0x5ad   : > { %4388 = vmatprep.mubr.msk.bf16.mxu0 %vm4867_vm13, %v4865_v47  ;;  %4373 = vmatpush3.bf16.msra.mxu0 %v4553_v60 }
 0x5ae   : > { %4369 = vmatmul.mubr.msk.bf16.vlgmr.msra.gmra.mxu1 %vm2070_vm11, %v2890_v59  ;;  %4374 = vmatprep.subr.bf16.mxu0 %v4865_v47 }
 0x5af   : > { %4408 = vmatprep.mubr.msk.bf16.mxu1 %vm4867_vm13, %v4865_v47  ;;  %4393 = vmatpush3.bf16.msra.mxu1 %v4561_v62 }
 0x5b0   : > { %4394 = vmatprep.subr.bf16.mxu1 %v4865_v47 }
 0x5b1   : > { %4375 = vmatpush3.bf16.msra.mxu0 %v4554_v50 }
 0x5b2   : > { %4376 = vmatprep.subr.bf16.mxu0 %v4865_v47 }
 0x5b3   : > { %4395 = vmatpush3.bf16.msra.mxu1 %v4562_v63 }
 0x5b4   : > { %4396 = vmatprep.subr.bf16.mxu1 %v4865_v47 }
 0x5b5   : > { %4377 = vmatpush3.bf16.msra.mxu0 %v4555_v51 }
 0x5b6   : > { %4378 = vmatprep.subr.bf16.mxu0 %v4865_v47 }
 0x5b9   : > { %4379 = vmatpush3.bf16.msra.mxu0 %v4556_v3 }
 0x5ba   : > { %4380 = vmatprep.subr.bf16.mxu0 %v4865_v47 }
 0x5bd   : > { %4381 = vmatpush3.bf16.msra.mxu0 %v4557_v54 }
 0x5be   : > { %4382 = vmatprep.subr.bf16.mxu0 %v4865_v47 }
 0x5c1   : > { %4383 = vmatpush3.bf16.msra.mxu0 %v4558_v56 }
 0x5c2   : > { %4384 = vmatprep.subr.bf16.mxu0 %v4865_v47 }
 0x5c5   : > { %4385 = vmatpush3.bf16.msra.mxu0 %v4559_v57 }
 0x5c6   : > { %4386 = vmatprep.subr.bf16.mxu0 %v4865_v47 }
 0x5c9   : > { %4387 = vmatpush3.bf16.msra.mxu0 %v4560_v58 }
 0x5ca   : > { %4412 = vmatprep.subr.bf16.mxu0 %v4865_v47 }
 0x634   : > { %v5679_v0 = vpop.f32.mrf.mxu0 }
 0x636   : > { %v4280_v1 = vpop.f32.mrf.mxu0  ;;  %v2256_v4 = vpop.f32.mrf.mxu1 }
 0x637   : > { %v3335_v5 = vrot.slane %v2256_v4, 7  ;;  %v2935_v50 = vpack.c.bf16 %v2256_v4, %v2256_v4 }
 0x638   : > { %v2211_v7 = vpop.f32.mrf.mxu0  ;;  %v4286_v2 = vpop.f32.mrf.mxu1 }
 0x639   : > { %v3336_v8 = vsel %vm2045_vm2, %v3335_v5, %v5679_v0  ;;  %v2990_v58 = vunpack.c.l.b16 %v2935_v50  ;;  %v2934_v2 = vpack.c.bf16 %v5679_v0, %v5679_v0 }
 0x63a   : > { %v4281_v9 = vpop.f32.mrf.mxu0  ;;  %v2259_v10 = vpop.f32.mrf.mxu1 }
 0x63c   : > { %v4287_v11 = vpop.f32.mrf.mxu1  ;;  %v2304_v21 = vpop.f32.mrf.mxu0 }
 0x63d   : > { %v3337_v15 = vrot.slane %v2304_v21, 6  ;;  %v2936_v62 = vpack.c.bf16 %v2304_v21, %v2304_v21 }
 0x63e   : > { %v4292_v22 = vpop.f32.mrf.mxu0  ;;  %v5683_v34 = vpop.f32.mrf.mxu1 }
 0x63f   : > { %v3338_v17 = vsel %vm2047_vm3, %v3337_v15, %v3336_v8  ;;  %v3339_v18 = vrot.slane %v5683_v34, 5  ;;  %v2937_v8 = vpack.c.bf16 %v5683_v34, %v5683_v34  ;;  %v3005_v22 = vrot.slane %v2990_v58, 7 }
 0x640   : > { %v2307_v27 = vpop.f32.mrf.mxu0  ;;  %v4298_v19 = vpop.f32.mrf.mxu1 }
 0x641   : > { %v3340_v20 = vsel %vm2049_vm5, %v3339_v18, %v3338_v17  ;;  %v2991_v17 = vunpack.c.l.b16 %v2936_v62 }
 0x642   : > { %v4293_v23 = vpop.f32.mrf.mxu0  ;;  %v2355_v28 = vpop.f32.mrf.mxu1 }
 0x643   : > { %v2989_v23 = vunpack.c.l.b16 %v2934_v2  ;;  %v2992_v28 = vunpack.c.l.b16 %v2937_v8 }
 0x644   : > { %v4299_v14 = vpop.f32.mrf.mxu1  ;;  %v5688_v24 = vpop.f32.mrf.mxu0 }
 0x645   : > { %v3341_v33 = vrot.slane %v5688_v24, 4  ;;  %v2938_v21 = vpack.c.bf16 %v5688_v24, %v5688_v24 }
 0x646   : > { %v4304_v12 = vpop.f32.mrf.mxu0  ;;  %v5691_v25 = vpop.f32.mrf.mxu1 }
 0x647   : > { %v3342_v26 = vsel %vm2051_vm6, %v3341_v33, %v3340_v20  ;;  %v3343_v35 = vrot.slane %v5691_v25, 3 }
 0x648   : > { %v2403_v42 = vpop.f32.mrf.mxu0  ;;  %v4310_v29 = vpop.f32.mrf.mxu1 }
 0x649   : > { %v3344_v39 = vsel %vm2053_vm7, %v3343_v35, %v3342_v26  ;;  %v3006_v26 = vsel %vm2045_vm2, %v3005_v22, %v2989_v23  ;;  %v3007_v35 = vrot.slane %v2991_v17, 6  ;;  %v2993_v42 = vunpack.c.l.b16 %v2938_v21 }
 0x64a   : > { %v4305_v30 = vpop.f32.mrf.mxu0  ;;  %v2451_v6 = vpop.f32.mrf.mxu1  ;;  %v2939_v29 = vpack.c.bf16 %v5691_v25, %v5691_v25 }
 0x64b   : > { %v3008_v25 = vsel %vm2047_vm3, %v3007_v35, %v3006_v26 }
 0x64c   : > { %v4311_v41 = vpop.f32.mrf.mxu1  ;;  %v5696_v31 = vpop.f32.mrf.mxu0 }
 0x64d   : > { %v3345_v36 = vrot.slane %v5696_v31, 2 }
 0x64e   : > { %v4316_v13 = vpop.f32.mrf.mxu0  ;;  %v5699_v46 = vpop.f32.mrf.mxu1 }
 0x64f   : > { %v3347_v37 = vrot.slane %v5699_v46, 1  ;;  %v3346_v49 = vsel %vm2055_vm8, %v3345_v36, %v3344_v39  ;;  %v3009_v13 = vrot.slane %v2992_v28, 5 }
 0x650   : > { %v2499_v38 = vpop.f32.mrf.mxu0  ;;  %v4322_v40 = vpop.f32.mrf.mxu1 }
 0x651   : > { %v5704_v43 = vsel %vm2057_vm9, %v3347_v37, %v3346_v49  ;;  %v2940_v37 = vpack.c.bf16 %v5696_v31, %v5696_v31 }
 0x652   : > { %v4317_v53 = vpop.f32.mrf.mxu0  ;;  %v2547_v44 = vpop.f32.mrf.mxu1 }
 0x654   : > { %v4323_v55 = vpop.f32.mrf.mxu1  ;;  %v2592_v45 = vpop.f32.mrf.mxu0 }
 0x655   : > { %v2942_v34 = vpack.c.bf16 %v2592_v45, %v2592_v45 }
 0x656   : > { %v4328_v48 = vpop.f32.mrf.mxu0  ;;  %v2640_v59 = vpop.f32.mrf.mxu1 }
 0x657   : > { %v3349_v60 = vrot.slane %v2640_v59, 7  ;;  %v2943_v5 = vpack.c.bf16 %v2640_v59, %v2640_v59  ;;  %v2997_v49 = vunpack.c.l.b16 %v2942_v34  ;;  %v3011_v59 = vrot.slane %v2993_v42, 4 }
 0x658   : > { %v2595_v51 = vpop.f32.mrf.mxu0  ;;  %v4334_v3 = vpop.f32.mrf.mxu1 }
 0x659   : > { %v3350_v54 = vsel %vm2045_vm2, %v3349_v60, %v2592_v45  ;;  %v2998_v19 = vunpack.c.l.b16 %v2943_v5  ;;  %v2994_v60 = vunpack.c.l.b16 %v2939_v29  ;;  %v2941_v3 = vpack.c.bf16 %v5699_v46, %v5699_v46 }
 0x65a   : > { %v4329_v56 = vpop.f32.mrf.mxu0  ;;  %v2643_v57 = vpop.f32.mrf.mxu1 }
 0x65b   : > { %v3019_v30 = vrot.slane %v2998_v19, 7  ;;  %v2995_v57 = vunpack.c.l.b16 %v2940_v37  ;;  %v3013_v8 = vrot.slane %v2994_v60, 3  ;;  %v2996_v46 = vunpack.c.l.b16 %v2941_v3 }
 0x65c   : > { %v4335_v63 = vpop.f32.mrf.mxu1  ;;  %v2688_v1 = vpop.f32.mrf.mxu0 }
 0x65d   : > { %v3351_v7 = vrot.slane %v2688_v1, 6  ;;  %v2944_v9 = vpack.c.bf16 %v2688_v1, %v2688_v1  ;;  %v3020_v31 = vsel %vm2045_vm2, %v3019_v30, %v2997_v49  ;;  %v3015_v22 = vrot.slane %v2995_v57, 2  ;;  %v4563_v49 = vld [vmem:[%s5910_s9 + $0x28] sm:$0xff]  }
 0x65e   : > { %v4340_v4 = vpop.f32.mrf.mxu0  ;;  %v2736_v10 = vpop.f32.mrf.mxu1  ;;  %4397 = vmatpush3.bf16.msra.mxu1 %v4563_v49 }
 0x65f   : > { %v3352_v11 = vsel %vm2047_vm3, %v3351_v7, %v3350_v54  ;;  %v3353_v15 = vrot.slane %v2736_v10, 5  ;;  %v2945_v20 = vpack.c.bf16 %v2736_v10, %v2736_v10  ;;  %v2999_v14 = vunpack.c.l.b16 %v2944_v9  ;;  %4398 = vmatprep.subr.bf16.mxu1 %v4865_v47 }
 0x660   : > { %v2691_v18 = vpop.f32.mrf.mxu0  ;;  %v4346_v27 = vpop.f32.mrf.mxu1  ;;  %v3010_v7 = vsel %vm2049_vm5, %v3009_v13, %v3008_v25 }
 0x661   : > { %v3354_v0 = vsel %vm2049_vm5, %v3353_v15, %v3352_v11  ;;  %v3000_v6 = vunpack.c.l.b16 %v2945_v20  ;;  %v3021_v38 = vrot.slane %v2999_v14, 6  ;;  %v3012_v2 = vsel %vm2051_vm6, %v3011_v59, %v3010_v7 }
 0x662   : > { %v4341_v33 = vpop.f32.mrf.mxu0  ;;  %v2739_v12 = vpop.f32.mrf.mxu1  ;;  %v3014_v28 = vsel %vm2053_vm7, %v3013_v8, %v3012_v2 }
 0x663   : > { %v3023_v54 = vrot.slane %v3000_v6, 5  ;;  %v3022_v58 = vsel %vm2047_vm3, %v3021_v38, %v3020_v31  ;;  %v3017_v33 = vrot.slane %v2996_v46, 1  ;;  %v3016_v42 = vsel %vm2055_vm8, %v3015_v22, %v3014_v28  ;;  %v4564_v38 = vld [vmem:[%s5910_s9 + $0x20] sm:$0xff]   ;;  %v4570_v46 = vld [vmem:[#allocation9 + $0x30] sm:$0xff]  }
 0x664   : > { %v4347_v24 = vpop.f32.mrf.mxu1  ;;  %v2784_v39 = vpop.f32.mrf.mxu0  ;;  %4399 = vmatpush3.bf16.msra.mxu1 %v4564_v38 }
 0x665   : > { %v2946_v41 = vpack.c.bf16 %v2784_v39, %v2784_v39  ;;  %v3355_v36 = vrot.slane %v2784_v39, 4  ;;  %v3024_v10 = vsel %vm2049_vm5, %v3023_v54, %v3022_v58  ;;  %4400 = vmatprep.subr.bf16.mxu1 %v4865_v47  ;;  %vm3270_vm5 = vcmask 7168  }
 0x666   : > { %v4352_v40 = vpop.f32.mrf.mxu0  ;;  %v2832_v53 = vpop.f32.mrf.mxu1 }
 0x667   : > { %v3001_v44 = vunpack.c.l.b16 %v2946_v41  ;;  %v3356_v55 = vsel %vm2051_vm6, %v3355_v36, %v3354_v0  ;;  %v2947_v45 = vpack.c.bf16 %v2832_v53, %v2832_v53  ;;  %v3357_v48 = vrot.slane %v2832_v53, 3  ;;  %v4565_v40 = vld [vmem:[%s5910_s9 + $0x18] sm:$0xff]   ;;  %v4566_v53 = vld [vmem:[%s5910_s9 + $0x10] sm:$0xff]  }
 0x668   : > { %v2787_v50 = vpop.f32.mrf.mxu0  ;;  %v4358_v51 = vpop.f32.mrf.mxu1  ;;  %v3018_v36 = vsel %vm2057_vm9, %v3017_v33, %v3016_v42  ;;  %4401 = vmatpush3.bf16.msra.mxu1 %v4565_v40 }
 0x669   : > { %v3358_v56 = vsel %vm2053_vm7, %v3357_v48, %v3356_v55  ;;  %v3025_v62 = vrot.slane %v3001_v44, 4  ;;  %v3002_v63 = vunpack.c.l.b16 %v2947_v45  ;;  %4402 = vmatprep.subr.bf16.mxu1 %v4865_v47  ;;  %v4567_v44 = vld [vmem:[%s5910_s9 + $0x8] sm:$0xff]   ;;  %v4568_v55 = vld [vmem:[%s5910_s9] sm:$0xff]  }
 0x66a   : > { %v4353_v1 = vpop.f32.mrf.mxu0  ;;  %v2835_v5 = vpop.f32.mrf.mxu1  ;;  %v3959_v45 = vld [vmem:[%s5909_s8] ss:$0 sm:$0xff] }
 0x66b   : > { %v3026_v17 = vsel %vm2051_vm6, %v3025_v62, %v3024_v10  ;;  %v3027_v21 = vrot.slane %v3002_v63, 3 }
 0x66c   : > { %v4359_v9 = vpop.f32.mrf.mxu1  ;;  %v2880_v4 = vpop.f32.mrf.mxu0  ;;  %4403 = vmatpush3.bf16.msra.mxu1 %v4566_v53 }
 0x66d   : > { %v2948_v11 = vpack.c.bf16 %v2880_v4, %v2880_v4  ;;  %v3359_v15 = vrot.slane %v2880_v4, 2  ;;  %v3028_v29 = vsel %vm2053_vm7, %v3027_v21, %v3026_v17  ;;  %4404 = vmatprep.subr.bf16.mxu1 %v4865_v47  ;;  %v4569_v4 = vld [vmem:[#allocation9 + $0x38] sm:$0xff]  }
 0x66e   : > { %v4364_v18 = vpop.f32.mrf.mxu0  ;;  %v2928_v27 = vpop.f32.mrf.mxu1 }
 0x66f   : > { %v3003_v19 = vunpack.c.l.b16 %v2948_v11  ;;  %v2949_v20 = vpack.c.bf16 %v2928_v27, %v2928_v27  ;;  %v3361_v0 = vrot.slane %v2928_v27, 1  ;;  %v3360_v23 = vsel %vm2055_vm8, %v3359_v15, %v3358_v56  ;;  %v3968_v56 = vld [vmem:[%s5911_s10] ss:$0 sm:$0xff] }
 0x670   : > { %v2883_v34 = vpop.f32.mrf.mxu0  ;;  %v4370_v14 = vpop.f32.mrf.mxu1  ;;  %4405 = vmatpush3.bf16.msra.mxu1 %v4567_v44 }
 0x671   : > { %v3029_v12 = vrot.slane %v3003_v19, 2  ;;  %v3004_v26 = vunpack.c.l.b16 %v2949_v20  ;;  %v5734_v35 = vsel %vm2057_vm9, %v3361_v0, %v3360_v23  ;;  %4406 = vmatprep.subr.bf16.mxu1 %v4865_v47 }
 0x672   : > { %v4365_v24 = vpop.f32.mrf.mxu0  ;;  %v2931_v39 = vpop.f32.mrf.mxu1 }
 0x673   : > { %v3030_v30 = vsel %vm2055_vm8, %v3029_v12, %v3028_v29  ;;  %v3031_v6 = vrot.slane %v3004_v26, 1 }
 0x674   : > { %v4371_v41 = vpop.f32.mrf.mxu1  ;;  %4407 = vmatpush3.bf16.msra.mxu1 %v4568_v55 }
 0x675   : > { %v3032_v13 = vsel %vm2057_vm9, %v3031_v6, %v3030_v30  ;;  %4432 = vmatprep.subr.bf16.mxu1 %v4865_v47 }
 0x676   : > { %v3033_v37 = vpack.c.b16 %v3032_v13, %v3018_v36 }
 0x678   : > { %4389 = vmatmul.mubr.bf16.vlgmr.msra.gmra.mxu0 %v3033_v37 }
 0x679   : > { %4428 = vmatprep.mubr.msk.bf16.mxu0 %vm4867_vm13, %v4865_v47  ;;  %4413 = vmatpush3.bf16.msra.mxu0 %v4569_v4 }
 0x67a   : > { %4414 = vmatprep.subr.bf16.mxu0 %v4865_v47 }
 0x67d   : > { %4415 = vmatpush3.bf16.msra.mxu0 %v4570_v46 }
 0x67e   : > { %4416 = vmatprep.subr.bf16.mxu0 %v4865_v47 }
 0x738   : > { %v3117_v48 = vpop.f32.mrf.mxu0 }
 0x739   : > { %v3118_v25 = vadd.f32 %v3959_v45, %v3117_v48 }
 0x73a   : > { %v4390_v59 = vpop.f32.mrf.mxu0 }
 0x73b   : > { %4657 = vtanh.f32 %v3118_v25 }
 0x73c   : > { %v3120_v60 = vpop.f32.mrf.mxu0 }
 0x73d   : > { %v3121_v50 = vadd.f32 %v3959_v45, %v3120_v60 }
 0x73e   : > { %v4391_v51 = vpop.f32.mrf.mxu0 }
 0x73f   : > { %4659 = vtanh.f32 %v3121_v50 }
 0x748   : > { %v4658_v3 = vpop.eup %4657 }
 0x74c   : > { %v4660_v31 = vpop.eup %4659 }
 0x74d   : > { %v3126_v54 = vpack.c.bf16 %v4660_v31, %v4658_v3  ;;  %v4571_v3 = vld [vmem:[#allocation9 + $0x28] sm:$0xff]   ;;  %v4572_v31 = vld [vmem:[#allocation9 + $0x20] sm:$0xff]  }
 0x74e   : > { %4417 = vmatpush3.bf16.msra.mxu0 %v4571_v3 }
 0x74f   : > { %4409 = vmatmul.mubr.bf16.vlgmr.msra.gmra.mxu1 %v3126_v54  ;;  %4418 = vmatprep.subr.bf16.mxu0 %v4865_v47  ;;  %v4573_v54 = vld [vmem:[#allocation9 + $0x18] sm:$0xff]  }
 0x750   : > { %4448 = vmatprep.mubr.msk.bf16.mxu1 %vm4867_vm13, %v4865_v47 }
 0x752   : > { %4419 = vmatpush3.bf16.msra.mxu0 %v4572_v31 }
 0x753   : > { %4420 = vmatprep.subr.bf16.mxu0 %v4865_v47 }
 0x756   : > { %4421 = vmatpush3.bf16.msra.mxu0 %v4573_v54 }
 0x757   : > { %4422 = vmatprep.subr.bf16.mxu0 %v4865_v47 }
 0x80f   : > { %v3232_v57 = vpop.f32.mrf.mxu1 }
 0x810   : > { %v3233_v58 = vadd.f32 %v3968_v56, %v3232_v57  ;;  %v4575_v57 = vld [vmem:[#allocation9 + $0x8] sm:$0xff]  }
 0x811   : > { %v4410_v62 = vpop.f32.mrf.mxu1 }
 0x812   : > { %3240 = vst.msk [vmem:[%s683_s30] sm:$0xff] %vm3239_vm0, %v3233_v58  ;;  %3244 = vrot.lane.b32.xlu0 %v3233_v58, %s4869_s28  ;;  %v4577_v62 = vld [vmem:[%s5914_s13 + $0x38] sm:$0xff]  }
 0x813   : > { %v3235_v63 = vpop.f32.mrf.mxu1  ;;  %4433 = vmatpush3.bf16.msra.mxu1 %v4577_v62 }
 0x814   : > { %v3236_v1 = vadd.f32 %v3968_v56, %v3235_v63  ;;  %v4574_v56 = vld [vmem:[#allocation9 + $0x10] sm:$0xff]   ;;  %4434 = vmatprep.subr.bf16.mxu1 %v4865_v47 }
 0x815   : > { %v4411_v5 = vpop.f32.mrf.mxu1  ;;  %4423 = vmatpush3.bf16.msra.mxu0 %v4574_v56  ;;  %v4578_v63 = vld [vmem:[%s5914_s13 + $0x30] sm:$0xff]  }
 0x816   : > { %3241 = vst.msk [vmem:[%s683_s30 + $0x8] sm:$0xff] %vm3239_vm0, %v3236_v1  ;;  %3246 = vrot.lane.b32.xlu1 %v3236_v1, %s4869_s28  ;;  %4424 = vmatprep.subr.bf16.mxu0 %v4865_v47  ;;  %s3652_s30 = scalar_lea.sflag [#allocation5], %s5143_s26 }
 0x817   : > { %4435 = vmatpush3.bf16.msra.mxu1 %v4578_v63 }
 0x818   : > { %4436 = vmatprep.subr.bf16.mxu1 %v4865_v47 }
 0x819   : > { %4425 = vmatpush3.bf16.msra.mxu0 %v4575_v57 }
 0x81a   : > { %4426 = vmatprep.subr.bf16.mxu0 %v4865_v47 }
 0x884   : > { %v3245_v7 = vpop.permute.xlu0 %3244 }
 0x885   : > { %vm3250_vm1 = vcmp.gt.f32.partialorder %v3233_v58, %v3245_v7 }
 0x886   : > { %v3252_v2 = vsel %vm3250_vm1, 1, %v4866_v32 }
 0x887   : > { %3254 = vrot.lane.b32.xlu1 %v3252_v2, %s4870_s22 }
 0x888   : > { %v3247_v8 = vpop.permute.xlu1 %3246 }
 0x889   : > { %vm3251_vm4 = vcmp.gt.f32.partialorder %v3236_v1, %v3247_v8 }
 0x88a   : > { %v3253_v9 = vsel %vm3251_vm4, 1, %v4866_v32 }
 0x88b   : > { %3262 = vrot.lane.b32.xlu1 %v3233_v58, %s4870_s22  ;;  %3256 = vrot.lane.b32.xlu0 %v3253_v9, %s4870_s22  ;;  %v4576_v58 = vld [vmem:[#allocation9] sm:$0xff]  }
 0x88c   : > { %4427 = vmatpush3.bf16.msra.mxu0 %v4576_v58 }
 0x88f   : > { %3264 = vrot.lane.b32.xlu0 %v3236_v1, %s4870_s22  ;;  %v4579_v1 = vld [vmem:[%s5914_s13 + $0x28] sm:$0xff]   ;;  %s4779_s22 = scalar_lea.vmem %s5847_s20, 32 }
 0x890   : > { %4437 = vmatpush3.bf16.msra.mxu1 %v4579_v1  ;;  %p4780_p7 = scmp.ne.s32.totalorder %s5847_s20, %s4779_s22  ;;  %p4787_p4 = scmp.lt.s32.totalorder %s4785_s6, %s4779_s22 }
 0x891   : > { %4438 = vmatprep.subr.bf16.mxu1 %v4865_v47 }
 0x892   : > { %p4781_p13 = pnand %p4780_p7, %p5965_p9  ;;  %p4788_p3 = por %p4787_p4, %p4786_p1 }
 0x894   : > { %p4782_p5 = pneg %p4781_p13 }
 0x896   : > { %p4789_p2 = pnand %p4788_p3, %p4782_p5 }
 0x8f9   : > { %v3255_v10 = vpop.permute.xlu1 %3254 }
 0x8fa   : > { %vm3258_vm3 = vcmp.ne.s32.totalorder %v3255_v10, 0 }
 0x8fb   : > { %vm3260_vm6 = vmand %vm1769_vm10, %vm3258_vm3 }
 0x8fd   : > { %v3257_v11 = vpop.permute.xlu0 %3256  ;;  %v3263_v15 = vpop.permute.xlu1 %3262 }
 0x8fe   : > { %vm3259_vm7 = vcmp.ne.s32.totalorder %v3257_v11, 0  ;;  %v3268_v32 = vsel %vm3260_vm6, %v3263_v15, -10000.0 }
 0x8ff   : > { %v3271_v22 = vsel %vm3270_vm5, %v3268_v32, -inf  ;;  %vm3261_vm8 = vmand %vm1770_vm12, %vm3259_vm7 }
 0x900   : > { %v3272_v17 = vrot.slane %v3271_v22, 4 }
 0x901   : > { %v3265_v21 = vpop.permute.xlu0 %3264 }
 0x902   : > { %v3273_v18 = vmax.f32 %v3271_v22, %v3272_v17  ;;  %v3269_v27 = vsel %vm3261_vm8, %v3265_v21, -10000.0 }
 0x903   : > { %v3278_v19 = vsel %vm3270_vm5, %v3269_v27, -inf }
 0x904   : > { %v3274_v20 = vrot.slane %v3273_v18, 2  ;;  %v3279_v0 = vrot.slane %v3278_v19, 4 }
 0x906   : > { %v3275_v23 = vmax.f32 %v3273_v18, %v3274_v20  ;;  %v3280_v28 = vmax.f32 %v3278_v19, %v3279_v0 }
 0x908   : > { %v3276_v61 = vrot.slane %v3275_v23, 1  ;;  %v3281_v34 = vrot.slane %v3280_v28, 2 }
 0x90a   : > { %v3277_v14 = vmax.f32 %v3275_v23, %v3276_v61  ;;  %v3282_v33 = vmax.f32 %v3280_v28, %v3281_v34  ;;  %v4580_v28 = vld [vmem:[%s5914_s13 + $0x20] sm:$0xff]   ;;  %v4581_v61 = vld [vmem:[%s5914_s13 + $0x18] sm:$0xff]   ;;  %v4582_v34 = vld [vmem:[%s5914_s13 + $0x10] sm:$0xff]  }
 0x90b   : > { %4439 = vmatpush3.bf16.msra.mxu1 %v4580_v28 }
 0x90c   : > { %v3285_v12 = vsub.f32 %v3268_v32, %v3277_v14  ;;  %v3283_v26 = vrot.slane %v3282_v33, 1  ;;  %4440 = vmatprep.subr.bf16.mxu1 %v4865_v47  ;;  %v4583_v14 = vld [vmem:[%s5914_s13 + $0x8] sm:$0xff]  }
 0x90e   : > { %v3287_v42 = vmul.f32 1.442695, %v3285_v12  ;;  %v3284_v29 = vmax.f32 %v3282_v33, %v3283_v26  ;;  %v4584_v33 = vld [vmem:[%s5914_s13] sm:$0xff]  }
 0x90f   : > { %4441 = vmatpush3.bf16.msra.mxu1 %v4581_v61  ;;  %v3977_v12 = vld [vmem:[%s5913_s12] ss:$0 sm:$0xff] }
 0x910   : > { %4661 = vpow2.f32 %v3287_v42  ;;  %v3286_v16 = vsub.f32 %v3269_v27, %v3284_v29  ;;  %4442 = vmatprep.subr.bf16.mxu1 %v4865_v47 }
 0x912   : > { %v3289_v24 = vmul.f32 1.442695, %v3286_v16 }
 0x913   : > { %4443 = vmatpush3.bf16.msra.mxu1 %v4582_v34 }
 0x914   : > { %4663 = vpow2.f32 %v3289_v24  ;;  %4444 = vmatprep.subr.bf16.mxu1 %v4865_v47 }
 0x917   : > { %4445 = vmatpush3.bf16.msra.mxu1 %v4583_v14 }
 0x918   : > { %4446 = vmatprep.subr.bf16.mxu1 %v4865_v47 }
 0x91b   : > { %4447 = vmatpush3.bf16.msra.mxu1 %v4584_v33 }
 0x91d   : > { %v4662_v39 = vpop.eup %4661 }
 0x91e   : > { %v3291_v30 = vsel %vm3270_vm5, %v4662_v39, 0.0 }
 0x91f   : > { %v3292_v6 = vrot.slane %v3291_v30, 4 }
 0x921   : > { %v4664_v41 = vpop.eup %4663  ;;  %v3293_v36 = vadd.f32 %v3292_v6, %v3291_v30 }
 0x922   : > { %v3298_v13 = vsel %vm3270_vm5, %v4664_v41, 0.0 }
 0x923   : > { %v3294_v37 = vrot.slane %v3293_v36, 2  ;;  %v3299_v49 = vrot.slane %v3298_v13, 4 }
 0x925   : > { %v3295_v38 = vadd.f32 %v3294_v37, %v3293_v36  ;;  %v3300_v40 = vadd.f32 %v3299_v49, %v3298_v13 }
 0x927   : > { %v3296_v53 = vrot.slane %v3295_v38, 1  ;;  %v3301_v44 = vrot.slane %v3300_v40, 2 }
 0x929   : > { %v3297_v55 = vadd.f32 %v3296_v53, %v3295_v38  ;;  %v3302_v45 = vadd.f32 %v3301_v44, %v3300_v40 }
 0x92b   : > { %4665 = vrcp.f32 %v3297_v55  ;;  %v3303_v48 = vrot.slane %v3302_v45, 1 }
 0x92d   : > { %v3304_v25 = vadd.f32 %v3303_v48, %v3302_v45 }
 0x92f   : > { %4667 = vrcp.f32 %v3304_v25 }
 0x938   : > { %v4666_v59 = vpop.eup %4665 }
 0x939   : > { %v3307_v60 = vmul.f32 %v4666_v59, %v4662_v39 }
 0x93b   : > { %3311 = vperm.xlu1 %4535, %v3307_v60  }
 0x93c   : > { %v4668_v50 = vpop.eup %4667 }
 0x93d   : > { %v3308_v51 = vmul.f32 %v4668_v50, %v4664_v41 }
 0x93f   : > { %3316 = vperm.xlu0 %4536, %v3308_v51  }
 0x9b6   : > { %v3312_v5 = vpop.permute.xlu1 %3311 }
 0x9b7   : > { %v3365_v7 = vmul.f32 %v5704_v43, %v3312_v5 }
 0x9b9   : > { %v3367_v2 = vrot.slane %v3365_v7, 4 }
 0x9ba   : > { %v3317_v8 = vpop.permute.xlu0 %3316 }
 0x9bb   : > { %v3368_v9 = vadd.f32 %v3367_v2, %v3365_v7  ;;  %v3366_v4 = vmul.f32 %v5734_v35, %v3317_v8 }
 0x9bd   : > { %v3369_v46 = vrot.slane %v3368_v9, 2  ;;  %v3373_v10 = vrot.slane %v3366_v4, 4 }
 0x9bf   : > { %v3370_v11 = vadd.f32 %v3369_v46, %v3368_v9  ;;  %v3374_v15 = vadd.f32 %v3373_v10, %v3366_v4 }
 0x9c1   : > { %v3371_v32 = vrot.slane %v3370_v11, 1  ;;  %v3375_v22 = vrot.slane %v3374_v15, 2 }
 0x9c3   : > { %v3372_v17 = vadd.f32 %v3371_v32, %v3370_v11  ;;  %v3376_v21 = vadd.f32 %v3375_v22, %v3374_v15 }
 0x9c5   : > { %3640 = vst [vmem:[%s5813_s25] sm:$0x1] %v3372_v17  ;;  %v3377_v43 = vrot.slane %v3376_v21, 1  ;;  %v3379_v18 = vpack.c.bf16 %v3372_v17, %v3372_v17 }
 0x9c7   : > { %v3378_v27 = vadd.f32 %v3377_v43, %v3376_v21  ;;  %v3406_v35 = vunpack.c.l.b16 %v3379_v18 }
 0x9c9   : > { %v3380_v19 = vpack.c.bf16 %v3378_v27, %v3378_v27  ;;  %3641 = vst [vmem:[%s5813_s25 + $0x1] sm:$0x1] %v3378_v27 }
 0x9cb   : > { %v3407_v20 = vunpack.c.l.b16 %v3380_v19 }
 0x9cd   : > { %v3408_v0 = vsel %vm2045_vm2, %v3407_v20, %v3406_v35 }
 0x9ce   : > { %v3409_v23 = vpack.c.b16 %v3408_v0, %v3408_v0 }
 0x9d0   : > { %4429 = vmatmul.mubr.bf16.vlgmr.msra.gmra.mxu0 %v3409_v23 }
 0xa90   : > { %v3493_v26 = vpop.f32.mrf.mxu0 }
 0xa91   : > { %v3494_v42 = vadd.f32 %v3977_v12, %v3493_v26 }
 0xa92   : > { %v4430_v29 = vpop.f32.mrf.mxu0 }
 0xa93   : > { %4669 = vtanh.f32 %v3494_v42 }
 0xa94   : > { %v3496_v16 = vpop.f32.mrf.mxu0 }
 0xa96   : > { %v4431_v24 = vpop.f32.mrf.mxu0 }
 0xaa0   : > { %v4670_v39 = vpop.eup %4669 }
 0xaa1   : > { %v3500_v30 = vpack.c.bf16 %v4670_v39, %v4670_v39 }
 0xaa3   : > { %4449 = vmatmul.mubr.bf16.vlgmr.msra.gmra.mxu1 %v3500_v30 }
 0xaa4   : > { %4792 = shalt.err (!%p4789_p2)
}
 0xaa5   : > { %s4793_s25 = scalar_lea.hbm %s5845_s19, 32  ;;  %s4797_s24 = scalar_lea.hbm %s5964_s17, 64 }
 0xaa6   : > { %p4794_p0 = scmp.ne.s32.totalorder %s5845_s19, %s4793_s25  ;;  %p4798_p10 = scmp.lt.s32.totalorder %s5845_s19, %s5964_s17 }
 0xaa7   : > { %p4799_p6 = scmp.lt.s32.totalorder %s4797_s24, %s4793_s25 }
 0xaa8   : > { %p4795_p8 = pnand %p4794_p0, %p5965_p9 }
 0xaa9   : > { %p4800_p12 = por %p4799_p6, %p4798_p10 }
 0xaaa   : > { %p4796_p11 = pneg %p4795_p8 }
 0xaac   : > { %p4801_p7 = pnand %p4800_p12, %p4796_p11 }
 0xaae   : > { %4804 = shalt.err (!%p4801_p7)
}
 0xaaf   : > { %s4872_s21 = smov 16   ;;  %s5966_s23 = sld [smem:[#allocation27_spill]]  ;;  %vm3637_vm2 = vcmask 16384  }
 0xab0   : > { %4464 = dma.vmem_to_hbm [thread:$0]  (%p5965_p9), %s5847_s20, 32, %s5845_s19, %s3652_s30, %s4872_s21, %s4872_s21, %s4869_s28  }
 0xab1   : > { %s5967_s14 = sld [smem:[#allocation28_spill]] }
 0xab5   : > { %v3986_v47 = vld [vmem:[%s5966_s23] ss:$0 sm:$0xff] }
 0xab7   : > { %s688_s0 = scalar_lea.vmem %s5967_s14, %s5978_s16 }
 0xb63   : > { %v3606_v6 = vpop.f32.mrf.mxu1 }
 0xb64   : > { %v3607_v41 = vadd.f32 %v3986_v47, %v3606_v6 }
 0xb65   : > { %v4450_v36 = vpop.f32.mrf.mxu1 }
 0xb66   : > { %v3619_v13 = vrot.slane %v3607_v41, %v5563_v52 }
 0xb67   : > { %v3609_v37 = vpop.f32.mrf.mxu1 }
 0xb68   : > { %v3620_v49 = vcombine.high %v3619_v13, %v3619_v13  ;;  %v3627_v38 = vrot.slane %v3619_v13, %v5563_v52 }
 0xb69   : > { %v4451_v40 = vpop.f32.mrf.mxu1 }
 0xb6a   : > { %v3634_v53 = vrot.slane %v3620_v49, %v5563_v52  ;;  %3638 = vst.msk [vmem:[%s688_s0] sm:$0x1] %vm3637_vm2, %v3627_v38 }
 0xb6c   : > { %3639 = vst.msk [vmem:[%s688_s0 + $0x1] sm:$0x1] %vm3637_vm2, %v3634_v53 }
 0xb6d PF: > { %s5968_s26 = sld [smem:[#allocation17_spill]]  ;;  %p5971_p13 = scmp.ge.s32.totalorder %s4855_s29, 2 }
 0xb6e   : > { %s5969_s28 = sld [smem:[#allocation19_spill]] }
 0xb73   : > { %s3703_s20 = sand.u32 1, %s5968_s26  }
 0xb74   : > { %p5970_p9 = scmp.ne.s32.totalorder %s5969_s28, 0  ;;  %s3704_s16 = scalar_lea.sflag [#allocation5], %s3703_s20 }
 0xb76   : > { %p4481_p5 = pnand %p5971_p13, %p5970_p9 }
 0xb78   : > { %p4482_p1 = pneg %p4481_p5 }
 0xb7a   : > { %4838 = dma.done.wait (%p4482_p1), %s3704_s16, 32  }
 0xb7b   : > { %4840 = vsyncadd (%p4482_p1), %s3704_s16, 4294967264  ;;  %s5972_s29 = sld [smem:[#allocation20_spill]]  ;;  %s5975_s26 = smov %s4847_s27 }
 0xb7c   : > { %s5973_s19 = sld [smem:[#allocation18_spill]] }
 0xb7d   : > { %s5974_s28 = sld [smem:[#allocation22_spill]] }
 0xb81   : > { %p37_p4 = scmp.ge.s32.totalorder %s5972_s29, 4  }
 0xb82   : > { %s5976_s27 = smov %s5973_s19 }
 0xb83   :  { %39 = sbr.rel (!%p37_p4) target bundleno = 16 (0x10), region = 173 }
 0xb88   :  { %3709 = vsyncpa [#allocation4], 1 }
 0xb89   :  { %3711 = vsyncpa [#allocation4 + $0x1], 1 }
 0xb8a   :  { %3712 = vsyncpa [#allocation7], 1 }
 0xb8b   :  { %3714 = vsyncpa [#allocation7 + $0x1], 1 }
 0xb8c   :  { %3715 = vsyncpa [#allocation10], 1 }
 0xb8d   :  { %3716 = vsyncpa [#allocation5], 1 }
 0xb8e   :  { %3718 = vsyncpa [#allocation5 + $0x1], 1 }

</bundles_post_ra>
